<compile_context>
chip_gen: v7x
topology: tpu7x:2x2x1
jax: 0.10.0
libtpu: 0.0.40
codegen_flags: <defaults>
</compile_context>

<pallas_src>
import functools
import math

import jax
import jax.numpy as jnp
import numpy as np
from jax import lax
from jax.experimental import pallas as pl
from jax.experimental.pallas import tpu as pltpu

NEG_INF = -1e9  # matches masked_fill_(mask == 0, -1000000000.0)


# ---------------------------------------------------------------------------
# Fused kernel: causal conv Q/K + value linear + masked MHA + output linear
# ---------------------------------------------------------------------------
def _decoder_self_attn_kernel(
    *refs, nb_head, d_k, kernel_size, use_mask, dropout_rate, train,
):
    if use_mask:
        (seed_ref, mask_ref, q_ref, k_ref, v_ref,
         wq_ref, bq_ref, wk_ref, bk_ref, wv_ref, bv_ref,
         wo_ref, bo_ref, o_ref) = refs
    else:
        (seed_ref, q_ref, k_ref, v_ref,
         wq_ref, bq_ref, wk_ref, bk_ref, wv_ref, bv_ref,
         wo_ref, bo_ref, o_ref) = refs
        mask_ref = None

    f32 = jnp.float32
    bn, T, D = q_ref.shape[1], q_ref.shape[2], q_ref.shape[3]
    P = kernel_size - 1
    cdt = q_ref.dtype          # MXU operand dtype == input dtype (bf16 stays bf16)

    q = q_ref[0]               # (bn, T, D)
    k = k_ref[0]
    v = v_ref[0]

    def causal_conv(x, w_ref, b_ref):
        # out[t] = bias + sum_kk x[t - (P - kk)] @ W_kk, zero where t - (P-kk) < 0.
        acc = jnp.broadcast_to(b_ref[...].astype(f32), (bn * T, D))
        for kk in range(kernel_size):
            shift = P - kk
            if shift == 0:
                tap = x.reshape(bn * T, D)
            else:
                tap = jnp.concatenate(
                    [jnp.zeros((bn, shift, D), x.dtype), x[:, :T - shift, :]],
                    axis=1).reshape(bn * T, D)
            acc = acc + jnp.dot(tap, w_ref[kk], preferred_element_type=f32)
        return acc.reshape(bn, T, D)

    # NOTE: 1/sqrt(d_k) is already folded into Wq / bq by the wrapper.
    q_c = causal_conv(q, wq_ref, bq_ref).astype(cdt)
    k_c = causal_conv(k, wk_ref, bk_ref).astype(cdt)
    v_l = (jnp.dot(v.reshape(bn * T, D), wv_ref[...], preferred_element_type=f32)
           + bv_ref[...].astype(f32)).reshape(bn, T, D).astype(cdt)

    add_mask = mask_ref[0][None, :, :] if use_mask else None   # (1, T, T) additive 0/-1e9 f32

    if train and dropout_rate > 0.0:
        # seed once per grid step; distinct stream per tile
        pltpu.prng_seed(seed_ref[0]
                        + pl.program_id(0) * pl.num_programs(1) + pl.program_id(1))
        drop_thresh = jnp.uint32(min(int(dropout_rate * (2.0 ** 32)), 2 ** 32 - 1))
        inv_keep = 1.0 / (1.0 - dropout_rate)

    # TODO(synk): for very long T, tile the key axis with an online (flash-style) softmax
    #             instead of materializing the full bn x T x T score matrix per head.
    ctx_parts = []
    for h in range(nb_head):   # TODO(synk): switch to lax.fori_loop + pl.ds for very large H
        lo = h * d_k
        qh = q_c[:, :, lo:lo + d_k]                          # (bn, T, d_k)
        kh = k_c[:, :, lo:lo + d_k]
        vh = v_l[:, :, lo:lo + d_k]
        s = jnp.einsum("btd,bsd->bts", qh, kh, preferred_element_type=f32)
        if use_mask:
            s = s + add_mask
        s = s - jnp.max(s, axis=-1, keepdims=True)
        p = jnp.exp(s)
        p = p * pl.reciprocal(jnp.sum(p, axis=-1, keepdims=True), approx=True)
        if train and dropout_rate > 0.0:
            # TODO(synk): on-chip PRNG dropout is not bit-identical to torch RNG streams.
            bits = pltpu.bitcast(pltpu.prng_random_bits(p.shape), jnp.uint32)
            p = p * (bits >= drop_thresh).astype(f32) * inv_keep
        ctx_parts.append(jnp.einsum("bts,bsd->btd", p.astype(cdt), vh,
                                    preferred_element_type=f32))

    # One full-D output-projection matmul instead of H thin (d_k-contraction) ones.
    ctx = jnp.concatenate(ctx_parts, axis=-1).astype(cdt).reshape(bn * T, D)
    out = (jnp.dot(ctx, wo_ref[...], preferred_element_type=f32)
           + bo_ref[...].astype(f32))
    o_ref[0] = out.reshape(bn, T, D).astype(o_ref.dtype)


# ---------------------------------------------------------------------------
# Generation-aware VMEM budgeting
# ---------------------------------------------------------------------------
def _vmem_limit_bytes():
    """Scoped-VMEM limit derived from the actual part (v5e/v6e: 128 MiB, v7x: 64 MiB/TC)."""
    try:
        cap = int(pltpu.get_tpu_info().vmem_capacity_bytes)
    except Exception:
        cap = 64 * 1024 * 1024          # conservative default (v7x-sized)
    return max(16 * 1024 * 1024, int(cap * 0.75))


def _pick_block_n(N, T, D, kernel_size, in_bytes, budget_bytes):
    """Largest divisor of N whose per-step working set fits the VMEM budget.

    Accounts for double-buffered I/O tiles, resident (double-buffered) weights,
    f32 conv/linear intermediates and the live TxT score/prob buffers.
    """
    w_res = ((2 * kernel_size + 2) * D * D + 4 * D) * in_bytes * 2   # weights, dbl-buffered
    best = 1
    for bn in range(1, N + 1):
        if N % bn:
            continue
        io = 4 * bn * T * D * in_bytes * 2       # q, k, v, out tiles (double-buffered)
        mask_t = T * T * 4 * 2                   # additive mask tile
        interm = 3 * bn * T * D * 4              # q_c / k_c / v_l (f32)
        scores = 3 * bn * T * T * 4              # live s / p buffers per head (f32)
        ctx = bn * T * D * 4                     # concatenated context (f32)
        if w_res + io + mask_t + interm + scores + ctx <= budget_bytes:
            best = bn
    return best


# ---------------------------------------------------------------------------
# Wrapper
# ---------------------------------------------------------------------------
def decoder_self_attn(query, key, value, params, *, nb_head, kernel_size=3, mask=None,
                      dropout_rate=0.0, train=False, seed=0, block_n=None):
    """out = DecoderSelfAttn(query, key, value, mask)   with q/k/v: (B, N, T, d_model)."""
    # TODO(synk): only the single-segment path (query_multi_segment=key_multi_segment=False)
    #             is implemented; multi-segment just re-applies the same causal conv per segment.
    B, N, T, D = query.shape
    assert D % nb_head == 0
    d_k = D // nb_head
    scale = 1.0 / math.sqrt(d_k)
    dt = query.dtype

    # torch-layout params -> matmul-ready (in, out) layouts, kept in the input dtype so the
    # MXU runs at full rate; the 1/sqrt(d_k) score scale is folded into the Q conv weights.
    wq = (jnp.transpose(params["conv_q_w"][:, :, 0, :], (2, 1, 0)) * scale).astype(dt)  # (K,Din,Dout)
    bq = (params["conv_q_b"] * scale).reshape(1, D).astype(dt)
    wk = jnp.transpose(params["conv_k_w"][:, :, 0, :], (2, 1, 0)).astype(dt)
    bk = params["conv_k_b"].reshape(1, D).astype(dt)
    wv = params["lin_v_w"].T.astype(dt)
    bv = params["lin_v_b"].reshape(1, D).astype(dt)
    wo = params["lin_o_w"].T.astype(dt)
    bo = params["lin_o_b"].reshape(1, D).astype(dt)

    use_mask = mask is not None
    if use_mask:
        add_mask = jnp.where(mask == 0, NEG_INF, 0.0).astype(jnp.float32)   # (B, T, T) additive

    in_bytes = jnp.dtype(dt).itemsize
    vmem_limit = _vmem_limit_bytes()
    if block_n is None:
        block_n = _pick_block_n(N, T, D, kernel_size, in_bytes, int(vmem_limit * 0.85))
        # keep >= 2 grid steps so both TensorCores of a v7x part get work
        while B * (N // block_n) < 2 and block_n > 1:
            block_n = max(d for d in range(1, block_n) if N % d == 0)
    assert N % block_n == 0
    grid = (B, N // block_n)

    seed_arr = jnp.asarray([seed], dtype=jnp.int32)

    kernel = functools.partial(
        _decoder_self_attn_kernel,
        nb_head=nb_head, d_k=d_k, kernel_size=kernel_size,
        use_mask=use_mask, dropout_rate=float(dropout_rate), train=bool(train))

    in_specs = [pl.BlockSpec(memory_space=pltpu.MemorySpace.SMEM)]            # seed
    args = [seed_arr]
    if use_mask:
        in_specs.append(pl.BlockSpec((1, T, T), lambda b, n: (b, 0, 0)))      # additive mask
        args.append(add_mask)
    in_specs += [
        pl.BlockSpec((1, block_n, T, D), lambda b, n: (b, n, 0, 0)),          # q (unpadded)
        pl.BlockSpec((1, block_n, T, D), lambda b, n: (b, n, 0, 0)),          # k (unpadded)
        pl.BlockSpec((1, block_n, T, D), lambda b, n: (b, n, 0, 0)),          # v
        pl.BlockSpec((kernel_size, D, D), lambda b, n: (0, 0, 0)),            # Wq taps (scaled)
        pl.BlockSpec((1, D), lambda b, n: (0, 0)),                            # bq (scaled)
        pl.BlockSpec((kernel_size, D, D), lambda b, n: (0, 0, 0)),            # Wk taps
        pl.BlockSpec((1, D), lambda b, n: (0, 0)),                            # bk
        pl.BlockSpec((D, D), lambda b, n: (0, 0)),                            # Wv
        pl.BlockSpec((1, D), lambda b, n: (0, 0)),                            # bv
        pl.BlockSpec((D, D), lambda b, n: (0, 0)),                            # Wo
        pl.BlockSpec((1, D), lambda b, n: (0, 0)),                            # bo
    ]
    args += [query, key, value, wq, bq, wk, bk, wv, bv, wo, bo]

    out = pl.pallas_call(
        kernel,
        out_shape=jax.ShapeDtypeStruct((B, N, T, D), query.dtype),
        grid=grid,
        in_specs=in_specs,
        out_specs=pl.BlockSpec((1, block_n, T, D), lambda b, n: (b, n, 0, 0)),
        compiler_params=pltpu.CompilerParams(
            dimension_semantics=("parallel", "parallel"),
            vmem_limit_bytes=vmem_limit),
    )(*args)
    return out


# ---------------------------------------------------------------------------
# Pure-JAX reference (mirrors the PyTorch forward, highest-precision matmuls)
# ---------------------------------------------------------------------------
def reference_forward(q, k, v, mask, p, *, nb_head, kernel_size):
    B, N, T, D = q.shape
    d_k = D // nb_head
    P = kernel_size - 1
    prec = lax.Precision.HIGHEST

    def causal_conv(x, w, b):
        xp = jnp.pad(x, ((0, 0), (0, 0), (P, 0), (0, 0)))
        out = b
        for kk in range(kernel_size):
            out = out + jnp.einsum("bntd,od->bnto", xp[:, :, kk:kk + T, :],
                                   w[:, :, 0, kk], precision=prec)
        return out

    qc = causal_conv(q, p["conv_q_w"], p["conv_q_b"])
    kc = causal_conv(k, p["conv_k_w"], p["conv_k_b"])
    vl = jnp.einsum("bntd,od->bnto", v, p["lin_v_w"], precision=prec) + p["lin_v_b"]

    def split_heads(x):
        return x.reshape(B, N, T, nb_head, d_k).transpose(0, 1, 3, 2, 4)

    qh, kh, vh = split_heads(qc), split_heads(kc), split_heads(vl)
    s = jnp.einsum("bnhtd,bnhsd->bnhts", qh, kh, precision=prec) / math.sqrt(d_k)
    if mask is not None:
        s = jnp.where(mask[:, None, None, :, :] == 0, NEG_INF, s)
    pa = jax.nn.softmax(s, axis=-1)
    ctx = jnp.einsum("bnhts,bnhsd->bnhtd", pa, vh, precision=prec)
    ctx = ctx.transpose(0, 1, 3, 2, 4).reshape(B, N, T, D)
    return jnp.einsum("bntd,od->bnto", ctx, p["lin_o_w"], precision=prec) + p["lin_o_b"]


# ---------------------------------------------------------------------------
# Demo / self-check
# ---------------------------------------------------------------------------
if __name__ == "__main__":
    B, N, T, D = 2, 4, 8, 32          # num_of_hours=2, points_per_hour=4 -> T=8
    H, K = 4, 3                       # nb_head=4 (d_k=8), kernel_size=3

    keys = jax.random.split(jax.random.PRNGKey(0), 13)
    q = jax.random.normal(keys[0], (B, N, T, D), jnp.float32)
    k = jax.random.normal(keys[1], (B, N, T, D), jnp.float32)
    v = jax.random.normal(keys[2], (B, N, T, D), jnp.float32)

    params = {
        "conv_q_w": 0.1 * jax.random.normal(keys[3], (D, D, 1, K), jnp.float32),
        "conv_q_b": 0.1 * jax.random.normal(keys[4], (D,), jnp.float32),
        "conv_k_w": 0.1 * jax.random.normal(keys[5], (D, D, 1, K), jnp.float32),
        "conv_k_b": 0.1 * jax.random.normal(keys[6], (D,), jnp.float32),
        "lin_v_w": 0.1 * jax.random.normal(keys[7], (D, D), jnp.float32),
        "lin_v_b": 0.1 * jax.random.normal(keys[8], (D,), jnp.float32),
        "lin_o_w": 0.1 * jax.random.normal(keys[9], (D, D), jnp.float32),
        "lin_o_b": 0.1 * jax.random.normal(keys[10], (D,), jnp.float32),
    }

    # decoder-style causal mask (batch, T, T)
    mask = jnp.tile(jnp.tril(jnp.ones((T, T), jnp.float32))[None], (B, 1, 1))

    out = decoder_self_attn(q, k, v, params, nb_head=H, kernel_size=K, mask=mask,
                            dropout_rate=0.0, train=False, seed=0)
    out = jax.block_until_ready(out)

    ref = reference_forward(q, k, v, mask, params, nb_head=H, kernel_size=K)
    # tolerance loosened slightly: softmax normalization uses the EUP approximate reciprocal
    np.testing.assert_allclose(np.asarray(out), np.asarray(ref), rtol=5e-3, atol=5e-3)

    print("KERNEL_OK")
</pallas_src>

<mosaic_0001>
module attributes {stable_mosaic.version = 11 : i64} {
  func.func @_decoder_self_attn_kernel(%arg0: i32, %arg1: i32, %arg2: memref<1xi32, #tpu.memory_space<smem>>, %arg3: memref<1x8x8xf32, #tpu.memory_space<vmem>>, %arg4: memref<1x4x8x32xf32, #tpu.memory_space<vmem>>, %arg5: memref<1x4x8x32xf32, #tpu.memory_space<vmem>>, %arg6: memref<1x4x8x32xf32, #tpu.memory_space<vmem>>, %arg7: memref<3x32x32xf32, #tpu.memory_space<vmem>>, %arg8: memref<1x32xf32, #tpu.memory_space<vmem>>, %arg9: memref<3x32x32xf32, #tpu.memory_space<vmem>>, %arg10: memref<1x32xf32, #tpu.memory_space<vmem>>, %arg11: memref<32x32xf32, #tpu.memory_space<vmem>>, %arg12: memref<1x32xf32, #tpu.memory_space<vmem>>, %arg13: memref<32x32xf32, #tpu.memory_space<vmem>>, %arg14: memref<1x32xf32, #tpu.memory_space<vmem>>, %arg15: memref<1x4x8x32xf32, #tpu.memory_space<vmem>>) attributes {dimension_semantics = [#tpu.dimension_semantics<parallel>, #tpu.dimension_semantics<parallel>], iteration_bounds = array<i64: 2, 1>, scalar_prefetch = 0 : i64, scratch_operands = 0 : i64, tpu.core_type = #tpu.core_type<tc>, window_params = [{transform_indices = @transform_0, window_bounds = array<i64: 1>}, {transform_indices = @transform_1, window_bounds = array<i64: 1, 8, 8>}, {transform_indices = @transform_2, window_bounds = array<i64: 1, 4, 8, 32>}, {transform_indices = @transform_3, window_bounds = array<i64: 1, 4, 8, 32>}, {transform_indices = @transform_4, window_bounds = array<i64: 1, 4, 8, 32>}, {pipeline_mode = #tpu.pipeline_mode<synchronous>, transform_indices = @transform_5, window_bounds = array<i64: 3, 32, 32>}, {pipeline_mode = #tpu.pipeline_mode<synchronous>, transform_indices = @transform_6, window_bounds = array<i64: 1, 32>}, {pipeline_mode = #tpu.pipeline_mode<synchronous>, transform_indices = @transform_7, window_bounds = array<i64: 3, 32, 32>}, {pipeline_mode = #tpu.pipeline_mode<synchronous>, transform_indices = @transform_8, window_bounds = array<i64: 1, 32>}, {pipeline_mode = #tpu.pipeline_mode<synchronous>, transform_indices = @transform_9, window_bounds = array<i64: 32, 32>}, {pipeline_mode = #tpu.pipeline_mode<synchronous>, transform_indices = @transform_10, window_bounds = array<i64: 1, 32>}, {pipeline_mode = #tpu.pipeline_mode<synchronous>, transform_indices = @transform_11, window_bounds = array<i64: 32, 32>}, {pipeline_mode = #tpu.pipeline_mode<synchronous>, transform_indices = @transform_12, window_bounds = array<i64: 1, 32>}, {transform_indices = @transform_13, window_bounds = array<i64: 1, 4, 8, 32>}]} {
    %c0 = arith.constant 0 : index
    %c0_0 = arith.constant 0 : index
    %c0_1 = arith.constant 0 : index
    %c0_2 = arith.constant 0 : index
    %0 = vector.load %arg4[%c0, %c0_0, %c0_1, %c0_2] : memref<1x4x8x32xf32, #tpu.memory_space<vmem>>, vector<1x4x8x32xf32>
    %1 = vector.shape_cast %0 : vector<1x4x8x32xf32> to vector<4x8x32xf32>
    %c0_3 = arith.constant 0 : index
    %c0_4 = arith.constant 0 : index
    %c0_5 = arith.constant 0 : index
    %c0_6 = arith.constant 0 : index
    %2 = vector.load %arg5[%c0_3, %c0_4, %c0_5, %c0_6] : memref<1x4x8x32xf32, #tpu.memory_space<vmem>>, vector<1x4x8x32xf32>
    %3 = vector.shape_cast %2 : vector<1x4x8x32xf32> to vector<4x8x32xf32>
    %c0_7 = arith.constant 0 : index
    %c0_8 = arith.constant 0 : index
    %c0_9 = arith.constant 0 : index
    %c0_10 = arith.constant 0 : index
    %4 = vector.load %arg6[%c0_7, %c0_8, %c0_9, %c0_10] : memref<1x4x8x32xf32, #tpu.memory_space<vmem>>, vector<1x4x8x32xf32>
    %5 = vector.shape_cast %4 : vector<1x4x8x32xf32> to vector<4x8x32xf32>
    %c0_11 = arith.constant 0 : index
    %c0_12 = arith.constant 0 : index
    %6 = vector.load %arg8[%c0_11, %c0_12] : memref<1x32xf32, #tpu.memory_space<vmem>>, vector<1x32xf32>
    %7 = vector.shape_cast %6 : vector<1x32xf32> to vector<1x32xf32>
    %8 = vector.broadcast %7 : vector<1x32xf32> to vector<32x32xf32>
    %cst = arith.constant 0.000000e+00 : f32
    %9 = vector.broadcast %cst : f32 to vector<4x2x32xf32>
    %10 = vector.extract_strided_slice %1 {offsets = [0, 0, 0], sizes = [4, 6, 32], strides = [1, 1, 1]} : vector<4x8x32xf32> to vector<4x6x32xf32>
    %11 = tpu.concatenate %9, %10 in 1 : vector<4x2x32xf32>, vector<4x6x32xf32> -> vector<4x8x32xf32>
    %12 = vector.shape_cast %11 : vector<4x8x32xf32> to vector<32x32xf32>
    %c0_13 = arith.constant 0 : index
    %c0_14 = arith.constant 0 : index
    %c0_15 = arith.constant 0 : index
    %13 = vector.load %arg7[%c0_13, %c0_14, %c0_15] : memref<3x32x32xf32, #tpu.memory_space<vmem>>, vector<1x32x32xf32>
    %14 = vector.shape_cast %13 : vector<1x32x32xf32> to vector<32x32xf32>
    %cst_16 = arith.constant dense<0.000000e+00> : vector<32x32xf32>
    %15 = tpu.matmul %12, %14, %cst_16 {dimension_numbers = #tpu.dot_dimension_numbers<[1], [0], [0], [1], [0, 0, 1, 1], [], []>} : vector<32x32xf32>, vector<32x32xf32>, vector<32x32xf32> -> vector<32x32xf32>
    %16 = arith.addf %8, %15 : vector<32x32xf32>
    %cst_17 = arith.constant 0.000000e+00 : f32
    %17 = vector.broadcast %cst_17 : f32 to vector<4x1x32xf32>
    %18 = vector.extract_strided_slice %1 {offsets = [0, 0, 0], sizes = [4, 7, 32], strides = [1, 1, 1]} : vector<4x8x32xf32> to vector<4x7x32xf32>
    %19 = tpu.concatenate %17, %18 in 1 : vector<4x1x32xf32>, vector<4x7x32xf32> -> vector<4x8x32xf32>
    %20 = vector.shape_cast %19 : vector<4x8x32xf32> to vector<32x32xf32>
    %c1 = arith.constant 1 : index
    %c0_18 = arith.constant 0 : index
    %c0_19 = arith.constant 0 : index
    %21 = vector.load %arg7[%c1, %c0_18, %c0_19] : memref<3x32x32xf32, #tpu.memory_space<vmem>>, vector<1x32x32xf32>
    %22 = vector.shape_cast %21 : vector<1x32x32xf32> to vector<32x32xf32>
    %cst_20 = arith.constant dense<0.000000e+00> : vector<32x32xf32>
    %23 = tpu.matmul %20, %22, %cst_20 {dimension_numbers = #tpu.dot_dimension_numbers<[1], [0], [0], [1], [0, 0, 1, 1], [], []>} : vector<32x32xf32>, vector<32x32xf32>, vector<32x32xf32> -> vector<32x32xf32>
    %24 = arith.addf %16, %23 : vector<32x32xf32>
    %25 = vector.shape_cast %1 : vector<4x8x32xf32> to vector<32x32xf32>
    %c2 = arith.constant 2 : index
    %c0_21 = arith.constant 0 : index
    %c0_22 = arith.constant 0 : index
    %26 = vector.load %arg7[%c2, %c0_21, %c0_22] : memref<3x32x32xf32, #tpu.memory_space<vmem>>, vector<1x32x32xf32>
    %27 = vector.shape_cast %26 : vector<1x32x32xf32> to vector<32x32xf32>
    %cst_23 = arith.constant dense<0.000000e+00> : vector<32x32xf32>
    %28 = tpu.matmul %25, %27, %cst_23 {dimension_numbers = #tpu.dot_dimension_numbers<[1], [0], [0], [1], [0, 0, 1, 1], [], []>} : vector<32x32xf32>, vector<32x32xf32>, vector<32x32xf32> -> vector<32x32xf32>
    %29 = arith.addf %24, %28 : vector<32x32xf32>
    %30 = vector.shape_cast %29 : vector<32x32xf32> to vector<4x8x32xf32>
    %c0_24 = arith.constant 0 : index
    %c0_25 = arith.constant 0 : index
    %31 = vector.load %arg10[%c0_24, %c0_25] : memref<1x32xf32, #tpu.memory_space<vmem>>, vector<1x32xf32>
    %32 = vector.shape_cast %31 : vector<1x32xf32> to vector<1x32xf32>
    %33 = vector.broadcast %32 : vector<1x32xf32> to vector<32x32xf32>
    %cst_26 = arith.constant 0.000000e+00 : f32
    %34 = vector.broadcast %cst_26 : f32 to vector<4x2x32xf32>
    %35 = vector.extract_strided_slice %3 {offsets = [0, 0, 0], sizes = [4, 6, 32], strides = [1, 1, 1]} : vector<4x8x32xf32> to vector<4x6x32xf32>
    %36 = tpu.concatenate %34, %35 in 1 : vector<4x2x32xf32>, vector<4x6x32xf32> -> vector<4x8x32xf32>
    %37 = vector.shape_cast %36 : vector<4x8x32xf32> to vector<32x32xf32>
    %c0_27 = arith.constant 0 : index
    %c0_28 = arith.constant 0 : index
    %c0_29 = arith.constant 0 : index
    %38 = vector.load %arg9[%c0_27, %c0_28, %c0_29] : memref<3x32x32xf32, #tpu.memory_space<vmem>>, vector<1x32x32xf32>
    %39 = vector.shape_cast %38 : vector<1x32x32xf32> to vector<32x32xf32>
    %cst_30 = arith.constant dense<0.000000e+00> : vector<32x32xf32>
    %40 = tpu.matmul %37, %39, %cst_30 {dimension_numbers = #tpu.dot_dimension_numbers<[1], [0], [0], [1], [0, 0, 1, 1], [], []>} : vector<32x32xf32>, vector<32x32xf32>, vector<32x32xf32> -> vector<32x32xf32>
    %41 = arith.addf %33, %40 : vector<32x32xf32>
    %cst_31 = arith.constant 0.000000e+00 : f32
    %42 = vector.broadcast %cst_31 : f32 to vector<4x1x32xf32>
    %43 = vector.extract_strided_slice %3 {offsets = [0, 0, 0], sizes = [4, 7, 32], strides = [1, 1, 1]} : vector<4x8x32xf32> to vector<4x7x32xf32>
    %44 = tpu.concatenate %42, %43 in 1 : vector<4x1x32xf32>, vector<4x7x32xf32> -> vector<4x8x32xf32>
    %45 = vector.shape_cast %44 : vector<4x8x32xf32> to vector<32x32xf32>
    %c1_32 = arith.constant 1 : index
    %c0_33 = arith.constant 0 : index
    %c0_34 = arith.constant 0 : index
    %46 = vector.load %arg9[%c1_32, %c0_33, %c0_34] : memref<3x32x32xf32, #tpu.memory_space<vmem>>, vector<1x32x32xf32>
    %47 = vector.shape_cast %46 : vector<1x32x32xf32> to vector<32x32xf32>
    %cst_35 = arith.constant dense<0.000000e+00> : vector<32x32xf32>
    %48 = tpu.matmul %45, %47, %cst_35 {dimension_numbers = #tpu.dot_dimension_numbers<[1], [0], [0], [1], [0, 0, 1, 1], [], []>} : vector<32x32xf32>, vector<32x32xf32>, vector<32x32xf32> -> vector<32x32xf32>
    %49 = arith.addf %41, %48 : vector<32x32xf32>
    %50 = vector.shape_cast %3 : vector<4x8x32xf32> to vector<32x32xf32>
    %c2_36 = arith.constant 2 : index
    %c0_37 = arith.constant 0 : index
    %c0_38 = arith.constant 0 : index
    %51 = vector.load %arg9[%c2_36, %c0_37, %c0_38] : memref<3x32x32xf32, #tpu.memory_space<vmem>>, vector<1x32x32xf32>
    %52 = vector.shape_cast %51 : vector<1x32x32xf32> to vector<32x32xf32>
    %cst_39 = arith.constant dense<0.000000e+00> : vector<32x32xf32>
    %53 = tpu.matmul %50, %52, %cst_39 {dimension_numbers = #tpu.dot_dimension_numbers<[1], [0], [0], [1], [0, 0, 1, 1], [], []>} : vector<32x32xf32>, vector<32x32xf32>, vector<32x32xf32> -> vector<32x32xf32>
    %54 = arith.addf %49, %53 : vector<32x32xf32>
    %55 = vector.shape_cast %54 : vector<32x32xf32> to vector<4x8x32xf32>
    %56 = vector.shape_cast %5 : vector<4x8x32xf32> to vector<32x32xf32>
    %c0_40 = arith.constant 0 : index
    %c0_41 = arith.constant 0 : index
    %57 = vector.load %arg11[%c0_40, %c0_41] : memref<32x32xf32, #tpu.memory_space<vmem>>, vector<32x32xf32>
    %cst_42 = arith.constant dense<0.000000e+00> : vector<32x32xf32>
    %58 = tpu.matmul %56, %57, %cst_42 {dimension_numbers = #tpu.dot_dimension_numbers<[1], [0], [0], [1], [0, 0, 1, 1], [], []>} : vector<32x32xf32>, vector<32x32xf32>, vector<32x32xf32> -> vector<32x32xf32>
    %c0_43 = arith.constant 0 : index
    %c0_44 = arith.constant 0 : index
    %59 = vector.load %arg12[%c0_43, %c0_44] : memref<1x32xf32, #tpu.memory_space<vmem>>, vector<1x32xf32>
    %60 = vector.broadcast %59 : vector<1x32xf32> to vector<32x32xf32>
    %61 = arith.addf %58, %60 : vector<32x32xf32>
    %62 = vector.shape_cast %61 : vector<32x32xf32> to vector<4x8x32xf32>
    %c0_45 = arith.constant 0 : index
    %c0_46 = arith.constant 0 : index
    %c0_47 = arith.constant 0 : index
    %63 = vector.load %arg3[%c0_45, %c0_46, %c0_47] : memref<1x8x8xf32, #tpu.memory_space<vmem>>, vector<1x8x8xf32>
    %64 = vector.shape_cast %63 : vector<1x8x8xf32> to vector<8x8xf32>
    %65 = vector.shape_cast %64 : vector<8x8xf32> to vector<1x8x8xf32>
    %66 = vector.extract_strided_slice %30 {offsets = [0, 0, 0], sizes = [4, 8, 8], strides = [1, 1, 1]} : vector<4x8x32xf32> to vector<4x8x8xf32>
    %67 = vector.extract_strided_slice %55 {offsets = [0, 0, 0], sizes = [4, 8, 8], strides = [1, 1, 1]} : vector<4x8x32xf32> to vector<4x8x8xf32>
    %68 = vector.extract_strided_slice %62 {offsets = [0, 0, 0], sizes = [4, 8, 8], strides = [1, 1, 1]} : vector<4x8x32xf32> to vector<4x8x8xf32>
    "tpu.trace_start"() <{level = 10 : i32, message = "btd,bsd->bts"}> : () -> ()
    %cst_48 = arith.constant dense<0.000000e+00> : vector<4x8x8xf32>
    %69 = tpu.matmul %66, %67, %cst_48 {dimension_numbers = #tpu.dot_dimension_numbers<[2], [2], [1], [1], [0, 0, 0, 1, 1, 1], [0], [0]>} : vector<4x8x8xf32>, vector<4x8x8xf32>, vector<4x8x8xf32> -> vector<4x8x8xf32>
    "tpu.trace_stop"() : () -> ()
    %70 = vector.broadcast %65 : vector<1x8x8xf32> to vector<4x8x8xf32>
    %71 = arith.addf %69, %70 : vector<4x8x8xf32>
    %cst_49 = arith.constant dense<0xFF800000> : vector<4x8xf32>
    %72 = vector.multi_reduction <maximumf>, %71, %cst_49 [2] : vector<4x8x8xf32> to vector<4x8xf32>
    %73 = vector.shape_cast %72 : vector<4x8xf32> to vector<4x8x1xf32>
    %74 = vector.broadcast %73 : vector<4x8x1xf32> to vector<4x8x8xf32>
    %75 = arith.subf %71, %74 : vector<4x8x8xf32>
    %76 = math.exp %75 : vector<4x8x8xf32>
    %cst_50 = arith.constant dense<0.000000e+00> : vector<4x8xf32>
    %77 = vector.multi_reduction <add>, %76, %cst_50 [2] : vector<4x8x8xf32> to vector<4x8xf32>
    %78 = vector.shape_cast %77 : vector<4x8xf32> to vector<4x8x1xf32>
    %79 = tpu.reciprocal %78 {approx = true} : vector<4x8x1xf32> -> vector<4x8x1xf32>
    %80 = vector.broadcast %79 : vector<4x8x1xf32> to vector<4x8x8xf32>
    %81 = arith.mulf %76, %80 : vector<4x8x8xf32>
    "tpu.trace_start"() <{level = 10 : i32, message = "bts,bsd->btd"}> : () -> ()
    %cst_51 = arith.constant dense<0.000000e+00> : vector<4x8x8xf32>
    %82 = tpu.matmul %81, %68, %cst_51 {dimension_numbers = #tpu.dot_dimension_numbers<[2], [1], [1], [2], [0, 0, 0, 1, 1, 2], [0], [0]>} : vector<4x8x8xf32>, vector<4x8x8xf32>, vector<4x8x8xf32> -> vector<4x8x8xf32>
    "tpu.trace_stop"() : () -> ()
    %83 = vector.extract_strided_slice %30 {offsets = [0, 0, 8], sizes = [4, 8, 8], strides = [1, 1, 1]} : vector<4x8x32xf32> to vector<4x8x8xf32>
    %84 = vector.extract_strided_slice %55 {offsets = [0, 0, 8], sizes = [4, 8, 8], strides = [1, 1, 1]} : vector<4x8x32xf32> to vector<4x8x8xf32>
    %85 = vector.extract_strided_slice %62 {offsets = [0, 0, 8], sizes = [4, 8, 8], strides = [1, 1, 1]} : vector<4x8x32xf32> to vector<4x8x8xf32>
    "tpu.trace_start"() <{level = 10 : i32, message = "btd,bsd->bts"}> : () -> ()
    %cst_52 = arith.constant dense<0.000000e+00> : vector<4x8x8xf32>
    %86 = tpu.matmul %83, %84, %cst_52 {dimension_numbers = #tpu.dot_dimension_numbers<[2], [2], [1], [1], [0, 0, 0, 1, 1, 1], [0], [0]>} : vector<4x8x8xf32>, vector<4x8x8xf32>, vector<4x8x8xf32> -> vector<4x8x8xf32>
    "tpu.trace_stop"() : () -> ()
    %87 = vector.broadcast %65 : vector<1x8x8xf32> to vector<4x8x8xf32>
    %88 = arith.addf %86, %87 : vector<4x8x8xf32>
    %cst_53 = arith.constant dense<0xFF800000> : vector<4x8xf32>
    %89 = vector.multi_reduction <maximumf>, %88, %cst_53 [2] : vector<4x8x8xf32> to vector<4x8xf32>
    %90 = vector.shape_cast %89 : vector<4x8xf32> to vector<4x8x1xf32>
    %91 = vector.broadcast %90 : vector<4x8x1xf32> to vector<4x8x8xf32>
    %92 = arith.subf %88, %91 : vector<4x8x8xf32>
    %93 = math.exp %92 : vector<4x8x8xf32>
    %cst_54 = arith.constant dense<0.000000e+00> : vector<4x8xf32>
    %94 = vector.multi_reduction <add>, %93, %cst_54 [2] : vector<4x8x8xf32> to vector<4x8xf32>
    %95 = vector.shape_cast %94 : vector<4x8xf32> to vector<4x8x1xf32>
    %96 = tpu.reciprocal %95 {approx = true} : vector<4x8x1xf32> -> vector<4x8x1xf32>
    %97 = vector.broadcast %96 : vector<4x8x1xf32> to vector<4x8x8xf32>
    %98 = arith.mulf %93, %97 : vector<4x8x8xf32>
    "tpu.trace_start"() <{level = 10 : i32, message = "bts,bsd->btd"}> : () -> ()
    %cst_55 = arith.constant dense<0.000000e+00> : vector<4x8x8xf32>
    %99 = tpu.matmul %98, %85, %cst_55 {dimension_numbers = #tpu.dot_dimension_numbers<[2], [1], [1], [2], [0, 0, 0, 1, 1, 2], [0], [0]>} : vector<4x8x8xf32>, vector<4x8x8xf32>, vector<4x8x8xf32> -> vector<4x8x8xf32>
    "tpu.trace_stop"() : () -> ()
    %100 = vector.extract_strided_slice %30 {offsets = [0, 0, 16], sizes = [4, 8, 8], strides = [1, 1, 1]} : vector<4x8x32xf32> to vector<4x8x8xf32>
    %101 = vector.extract_strided_slice %55 {offsets = [0, 0, 16], sizes = [4, 8, 8], strides = [1, 1, 1]} : vector<4x8x32xf32> to vector<4x8x8xf32>
    %102 = vector.extract_strided_slice %62 {offsets = [0, 0, 16], sizes = [4, 8, 8], strides = [1, 1, 1]} : vector<4x8x32xf32> to vector<4x8x8xf32>
    "tpu.trace_start"() <{level = 10 : i32, message = "btd,bsd->bts"}> : () -> ()
    %cst_56 = arith.constant dense<0.000000e+00> : vector<4x8x8xf32>
    %103 = tpu.matmul %100, %101, %cst_56 {dimension_numbers = #tpu.dot_dimension_numbers<[2], [2], [1], [1], [0, 0, 0, 1, 1, 1], [0], [0]>} : vector<4x8x8xf32>, vector<4x8x8xf32>, vector<4x8x8xf32> -> vector<4x8x8xf32>
    "tpu.trace_stop"() : () -> ()
    %104 = vector.broadcast %65 : vector<1x8x8xf32> to vector<4x8x8xf32>
    %105 = arith.addf %103, %104 : vector<4x8x8xf32>
    %cst_57 = arith.constant dense<0xFF800000> : vector<4x8xf32>
    %106 = vector.multi_reduction <maximumf>, %105, %cst_57 [2] : vector<4x8x8xf32> to vector<4x8xf32>
    %107 = vector.shape_cast %106 : vector<4x8xf32> to vector<4x8x1xf32>
    %108 = vector.broadcast %107 : vector<4x8x1xf32> to vector<4x8x8xf32>
    %109 = arith.subf %105, %108 : vector<4x8x8xf32>
    %110 = math.exp %109 : vector<4x8x8xf32>
    %cst_58 = arith.constant dense<0.000000e+00> : vector<4x8xf32>
    %111 = vector.multi_reduction <add>, %110, %cst_58 [2] : vector<4x8x8xf32> to vector<4x8xf32>
    %112 = vector.shape_cast %111 : vector<4x8xf32> to vector<4x8x1xf32>
    %113 = tpu.reciprocal %112 {approx = true} : vector<4x8x1xf32> -> vector<4x8x1xf32>
    %114 = vector.broadcast %113 : vector<4x8x1xf32> to vector<4x8x8xf32>
    %115 = arith.mulf %110, %114 : vector<4x8x8xf32>
    "tpu.trace_start"() <{level = 10 : i32, message = "bts,bsd->btd"}> : () -> ()
    %cst_59 = arith.constant dense<0.000000e+00> : vector<4x8x8xf32>
    %116 = tpu.matmul %115, %102, %cst_59 {dimension_numbers = #tpu.dot_dimension_numbers<[2], [1], [1], [2], [0, 0, 0, 1, 1, 2], [0], [0]>} : vector<4x8x8xf32>, vector<4x8x8xf32>, vector<4x8x8xf32> -> vector<4x8x8xf32>
    "tpu.trace_stop"() : () -> ()
    %117 = vector.extract_strided_slice %30 {offsets = [0, 0, 24], sizes = [4, 8, 8], strides = [1, 1, 1]} : vector<4x8x32xf32> to vector<4x8x8xf32>
    %118 = vector.extract_strided_slice %55 {offsets = [0, 0, 24], sizes = [4, 8, 8], strides = [1, 1, 1]} : vector<4x8x32xf32> to vector<4x8x8xf32>
    %119 = vector.extract_strided_slice %62 {offsets = [0, 0, 24], sizes = [4, 8, 8], strides = [1, 1, 1]} : vector<4x8x32xf32> to vector<4x8x8xf32>
    "tpu.trace_start"() <{level = 10 : i32, message = "btd,bsd->bts"}> : () -> ()
    %cst_60 = arith.constant dense<0.000000e+00> : vector<4x8x8xf32>
    %120 = tpu.matmul %117, %118, %cst_60 {dimension_numbers = #tpu.dot_dimension_numbers<[2], [2], [1], [1], [0, 0, 0, 1, 1, 1], [0], [0]>} : vector<4x8x8xf32>, vector<4x8x8xf32>, vector<4x8x8xf32> -> vector<4x8x8xf32>
    "tpu.trace_stop"() : () -> ()
    %121 = vector.broadcast %65 : vector<1x8x8xf32> to vector<4x8x8xf32>
    %122 = arith.addf %120, %121 : vector<4x8x8xf32>
    %cst_61 = arith.constant dense<0xFF800000> : vector<4x8xf32>
    %123 = vector.multi_reduction <maximumf>, %122, %cst_61 [2] : vector<4x8x8xf32> to vector<4x8xf32>
    %124 = vector.shape_cast %123 : vector<4x8xf32> to vector<4x8x1xf32>
    %125 = vector.broadcast %124 : vector<4x8x1xf32> to vector<4x8x8xf32>
    %126 = arith.subf %122, %125 : vector<4x8x8xf32>
    %127 = math.exp %126 : vector<4x8x8xf32>
    %cst_62 = arith.constant dense<0.000000e+00> : vector<4x8xf32>
    %128 = vector.multi_reduction <add>, %127, %cst_62 [2] : vector<4x8x8xf32> to vector<4x8xf32>
    %129 = vector.shape_cast %128 : vector<4x8xf32> to vector<4x8x1xf32>
    %130 = tpu.reciprocal %129 {approx = true} : vector<4x8x1xf32> -> vector<4x8x1xf32>
    %131 = vector.broadcast %130 : vector<4x8x1xf32> to vector<4x8x8xf32>
    %132 = arith.mulf %127, %131 : vector<4x8x8xf32>
    "tpu.trace_start"() <{level = 10 : i32, message = "bts,bsd->btd"}> : () -> ()
    %cst_63 = arith.constant dense<0.000000e+00> : vector<4x8x8xf32>
    %133 = tpu.matmul %132, %119, %cst_63 {dimension_numbers = #tpu.dot_dimension_numbers<[2], [1], [1], [2], [0, 0, 0, 1, 1, 2], [0], [0]>} : vector<4x8x8xf32>, vector<4x8x8xf32>, vector<4x8x8xf32> -> vector<4x8x8xf32>
    "tpu.trace_stop"() : () -> ()
    %134 = tpu.concatenate %82, %99, %116, %133 in 2 : vector<4x8x8xf32>, vector<4x8x8xf32>, vector<4x8x8xf32>, vector<4x8x8xf32> -> vector<4x8x32xf32>
    %135 = vector.shape_cast %134 : vector<4x8x32xf32> to vector<32x32xf32>
    %c0_64 = arith.constant 0 : index
    %c0_65 = arith.constant 0 : index
    %136 = vector.load %arg13[%c0_64, %c0_65] : memref<32x32xf32, #tpu.memory_space<vmem>>, vector<32x32xf32>
    %cst_66 = arith.constant dense<0.000000e+00> : vector<32x32xf32>
    %137 = tpu.matmul %135, %136, %cst_66 {dimension_numbers = #tpu.dot_dimension_numbers<[1], [0], [0], [1], [0, 0, 1, 1], [], []>} : vector<32x32xf32>, vector<32x32xf32>, vector<32x32xf32> -> vector<32x32xf32>
    %c0_67 = arith.constant 0 : index
    %c0_68 = arith.constant 0 : index
    %138 = vector.load %arg14[%c0_67, %c0_68] : memref<1x32xf32, #tpu.memory_space<vmem>>, vector<1x32xf32>
    %139 = vector.broadcast %138 : vector<1x32xf32> to vector<32x32xf32>
    %140 = arith.addf %137, %139 : vector<32x32xf32>
    %141 = vector.shape_cast %140 : vector<32x32xf32> to vector<4x8x32xf32>
    %c0_69 = arith.constant 0 : index
    %c0_70 = arith.constant 0 : index
    %c0_71 = arith.constant 0 : index
    %c0_72 = arith.constant 0 : index
    %142 = vector.load %arg15[%c0_69, %c0_70, %c0_71, %c0_72] : memref<1x4x8x32xf32, #tpu.memory_space<vmem>>, vector<1x4x8x32xf32>
    %143 = vector.shape_cast %142 : vector<1x4x8x32xf32> to vector<4x8x32xf32>
    %144 = vector.shape_cast %141 : vector<4x8x32xf32> to vector<1x4x8x32xf32>
    tpu.vector_store %arg15[%c0_69, %c0_70, %c0_71, %c0_72], %144 {strides = array<i32>} : memref<1x4x8x32xf32, #tpu.memory_space<vmem>>, vector<1x4x8x32xf32>,
    return
  }
  func.func @transform_0(%arg0: i32, %arg1: i32) -> i32 {
    %c0_i32 = arith.constant 0 : i32
    %c0_i32_0 = arith.constant 0 : i32
    return %c0_i32 : i32
  }
  func.func @transform_1(%arg0: i32, %arg1: i32) -> (i32, i32, i32) {
    %c0_i32 = arith.constant 0 : i32
    %c0_i32_0 = arith.constant 0 : i32
    %c0_i32_1 = arith.constant 0 : i32
    return %arg0, %c0_i32, %c0_i32_0 : i32, i32, i32
  }
  func.func @transform_2(%arg0: i32, %arg1: i32) -> (i32, i32, i32, i32) {
    %c0_i32 = arith.constant 0 : i32
    %c0_i32_0 = arith.constant 0 : i32
    %c0_i32_1 = arith.constant 0 : i32
    return %arg0, %arg1, %c0_i32, %c0_i32_0 : i32, i32, i32, i32
  }
  func.func @transform_3(%arg0: i32, %arg1: i32) -> (i32, i32, i32, i32) {
    %c0_i32 = arith.constant 0 : i32
    %c0_i32_0 = arith.constant 0 : i32
    %c0_i32_1 = arith.constant 0 : i32
    return %arg0, %arg1, %c0_i32, %c0_i32_0 : i32, i32, i32, i32
  }
  func.func @transform_4(%arg0: i32, %arg1: i32) -> (i32, i32, i32, i32) {
    %c0_i32 = arith.constant 0 : i32
    %c0_i32_0 = arith.constant 0 : i32
    %c0_i32_1 = arith.constant 0 : i32
    return %arg0, %arg1, %c0_i32, %c0_i32_0 : i32, i32, i32, i32
  }
  func.func @transform_5(%arg0: i32, %arg1: i32) -> (i32, i32, i32) {
    %c0_i32 = arith.constant 0 : i32
    %c0_i32_0 = arith.constant 0 : i32
    %c0_i32_1 = arith.constant 0 : i32
    %c0_i32_2 = arith.constant 0 : i32
    return %c0_i32, %c0_i32_0, %c0_i32_1 : i32, i32, i32
  }
  func.func @transform_6(%arg0: i32, %arg1: i32) -> (i32, i32) {
    %c0_i32 = arith.constant 0 : i32
    %c0_i32_0 = arith.constant 0 : i32
    %c0_i32_1 = arith.constant 0 : i32
    return %c0_i32, %c0_i32_0 : i32, i32
  }
  func.func @transform_7(%arg0: i32, %arg1: i32) -> (i32, i32, i32) {
    %c0_i32 = arith.constant 0 : i32
    %c0_i32_0 = arith.constant 0 : i32
    %c0_i32_1 = arith.constant 0 : i32
    %c0_i32_2 = arith.constant 0 : i32
    return %c0_i32, %c0_i32_0, %c0_i32_1 : i32, i32, i32
  }
  func.func @transform_8(%arg0: i32, %arg1: i32) -> (i32, i32) {
    %c0_i32 = arith.constant 0 : i32
    %c0_i32_0 = arith.constant 0 : i32
    %c0_i32_1 = arith.constant 0 : i32
    return %c0_i32, %c0_i32_0 : i32, i32
  }
  func.func @transform_9(%arg0: i32, %arg1: i32) -> (i32, i32) {
    %c0_i32 = arith.constant 0 : i32
    %c0_i32_0 = arith.constant 0 : i32
    %c0_i32_1 = arith.constant 0 : i32
    return %c0_i32, %c0_i32_0 : i32, i32
  }
  func.func @transform_10(%arg0: i32, %arg1: i32) -> (i32, i32) {
    %c0_i32 = arith.constant 0 : i32
    %c0_i32_0 = arith.constant 0 : i32
    %c0_i32_1 = arith.constant 0 : i32
    return %c0_i32, %c0_i32_0 : i32, i32
  }
  func.func @transform_11(%arg0: i32, %arg1: i32) -> (i32, i32) {
    %c0_i32 = arith.constant 0 : i32
    %c0_i32_0 = arith.constant 0 : i32
    %c0_i32_1 = arith.constant 0 : i32
    return %c0_i32, %c0_i32_0 : i32, i32
  }
  func.func @transform_12(%arg0: i32, %arg1: i32) -> (i32, i32) {
    %c0_i32 = arith.constant 0 : i32
    %c0_i32_0 = arith.constant 0 : i32
    %c0_i32_1 = arith.constant 0 : i32
    return %c0_i32, %c0_i32_0 : i32, i32
  }
  func.func @transform_13(%arg0: i32, %arg1: i32) -> (i32, i32, i32, i32) {
    %c0_i32 = arith.constant 0 : i32
    %c0_i32_0 = arith.constant 0 : i32
    %c0_i32_1 = arith.constant 0 : i32
    return %arg0, %arg1, %c0_i32, %c0_i32_0 : i32, i32, i32, i32
  }
}

</mosaic_0001>

<bundles_post_ra>
// kernel: tpu_custom_call.1
= control target key start
LH: loop header
LB: loop body
LE: loop exit
PB: predicated region body
PF: predicated region fallthrough
CT: control target
= control target key end

     0   :  { %s6556_s0 = inlined_call_operand.<no memory space> [shape: s32[1], index: 0, kind: input, shape index: {}]   ;;  %s6557_s1 = inlined_call_operand.hbm [shape: f32[2,8,8], index: 1, kind: input, shape index: {}]   ;;  %s6558_s2 = inlined_call_operand.hbm [shape: f32[2,4,8,32], index: 2, kind: input, shape index: {}]   ;;  %s6559_s3 = inlined_call_operand.hbm [shape: f32[2,4,8,32], index: 3, kind: input, shape index: {}]   ;;  %s6560_s4 = inlined_call_operand.hbm [shape: f32[2,4,8,32], index: 4, kind: input, shape index: {}]   ;;  %s6561_s5 = inlined_call_operand.hbm [shape: f32[3,32,32], index: 5, kind: input, shape index: {}]   ;;  %s6562_s6 = inlined_call_operand.vmem [shape: f32[1,32], index: 6, kind: input, shape index: {}]   ;;  %s6563_s7 = inlined_call_operand.hbm [shape: f32[3,32,32], index: 7, kind: input, shape index: {}]   ;;  %s6564_s8 = inlined_call_operand.vmem [shape: f32[1,32], index: 8, kind: input, shape index: {}]   ;;  %s6565_s9 = inlined_call_operand.vmem [shape: f32[32,32], index: 9, kind: input, shape index: {}]   ;;  %s6566_s10 = inlined_call_operand.vmem [shape: f32[1,32], index: 10, kind: input, shape index: {}]   ;;  %s6567_s11 = inlined_call_operand.hbm [shape: f32[32,32], index: 11, kind: input, shape index: {}]   ;;  %s6568_s12 = inlined_call_operand.vmem [shape: f32[1,32], index: 12, kind: input, shape index: {}]   ;;  %s6569_s13 = inlined_call_operand.hbm [shape: f32[2,4,8,32], index: 13, kind: output, shape index: {}]  }
   0x1   :  { %6594 = sst [smem:[#allocation30_spill]] %s6558_s2 }
   0x2   :  { %6595 = sst [smem:[#allocation31_spill]] %s6561_s5 }
   0x3   :  { %6596 = sst [smem:[#allocation32_spill]] %s6562_s6 }
   0x4   :  { %6597 = sst [smem:[#allocation33_spill]] %s6563_s7 }
   0x5   :  { %6598 = sst [smem:[#allocation34_spill]] %s6564_s8 }
   0x6   :  { %6599 = sst [smem:[#allocation35_spill]] %s6565_s9 }
   0x7   :  { %6600 = sst [smem:[#allocation36_spill]] %s6566_s10 }
   0x8   :  { %6601 = sst [smem:[#allocation37_spill]] %s6568_s12 }
   0x9   :  { %6602 = sst [smem:[#allocation38_spill]] %s6569_s13 }
   0xa   :  { %19 = vsyncpa [#allocation4], 0 }
   0xb   :  { %21 = vsyncpa [#allocation4 + $0x1], 0 }
   0xc   :  { %22 = vsyncpa [#allocation7], 0 }
   0xd   :  { %24 = vsyncpa [#allocation7 + $0x1], 0 }
   0xe   :  { %25 = vsyncpa [#allocation10], 0 }
   0xf   :  { %27 = vsyncpa [#allocation10 + $0x1], 0 }
  0x10   :  { %28 = vsyncpa [#allocation13], 0 }
  0x11   :  { %29 = vsyncpa [#allocation5], 0 }
  0x12   :  { %31 = vsyncpa [#allocation5 + $0x1], 0  ;;  %s5653_s24 = smov 0   ;;  %s5655_s25 = smov 0  }
  0x13   :  { %s5657_s26 = smov 0   ;;  %s5659_s27 = smov 0  }
  0x14   :  { %s5661_s28 = smov 0   ;;  %s5663_s0 = smov 0  }
  0x15 LB: > { %6603 = sst [smem:[#allocation22_spill]] %s5542_s24  ;;  %s5684_s29 = sadd.s32 4294967295, %s5562_s0   ;;  %s5562_s0 = sphi %s5663_s0, %s37_s0   ;;  %s5558_s28 = sphi %s5661_s28, %s6658_s28   ;;  %s5554_s27 = sphi %s5659_s27, %s6657_s27   ;;  %s5550_s26 = sphi %s5657_s26, %s6653_s26   ;;  %s5546_s25 = sphi %s5655_s25, %s6656_s25   ;;  %s5542_s24 = sphi %s5653_s24, %s6655_s24  }
  0x16   : > { %6604 = sst [smem:[#allocation23_spill]] %s5550_s26  ;;  %s4470_s30 = sadd.s32 4294967294, %s5562_s0  }
  0x17   : > { %6605 = sst [smem:[#allocation24_spill]] %s5554_s27  ;;  %p84_p0 = scmp.ne.s32.totalorder %s5550_s26, %s5546_s25 }
  0x18   : > { %6606 = sst [smem:[#allocation25_spill]] %s5684_s29  ;;  %p85_p1 = scmp.eq.s32.totalorder %s5562_s0, 0 }
  0x19   : > { %p90_p2 = scmp.ne.s32.totalorder %s5546_s25, %s5542_s24  ;;  %p6575_p3 = scmp.eq.s32.totalorder %s5684_s29, 0 }
  0x1a   : > { %p368_p4 = scmp.eq.s32.totalorder %s5684_s29, 1  ;;  %p5695_p5 = por %p85_p1, %p84_p0 }
  0x1b   : > { %p374_p6 = scmp.eq.s32.totalorder %s4470_s30, 1  ;;  %p5701_p7 = por %p6575_p3, %p90_p2 }
  0x1c   : > { %p5705_p8 = por %p368_p4, %p84_p0  ;;  %p4471_p10 = scmp.ge.s32.totalorder %s5562_s0, 1 }
  0x1d   : > { %s6608_s16 = scalar_select %p5701_p7, 1, 0 }
  0x1e   : > { %s6609_s17 = scalar_select %p5705_p8, 1, 0 }
  0x1f   : > { %p5709_p9 = por %p374_p6, %p90_p2  ;;  %p381_p11 = scmp.lt.s32.totalorder %s5562_s0, 3 }
  0x20   : > { %6610 = sst [smem:[#allocation26_spill]] %s6609_s17  ;;  %s5564_s20 = smov [#allocation11]  }
  0x21   : > { %s6611_s18 = scalar_select %p5709_p9, 1, 0 }
  0x22   : > { %p5715_p12 = pnand %p4471_p10, %p381_p11  ;;  %s396_s21 = sshll.u32 %s5564_s20, 4  ;;  %s5719_s21 = int_to_ptr.vmem [resolvable:$true] %s396_s21 }
  0x23   : > { %6612 = sst [smem:[#allocation27_spill]] %s6611_s18  ;;  %s5565_s23 = smov [#allocation12]  }
  0x24   : > { %s6613_s19 = scalar_select %p5715_p12, 1, 0 }
  0x25   : > { %p5099_p13 = pneg %p5715_p12  ;;  %s412_s30 = sshll.u32 %s5565_s23, 4  ;;  %s5730_s30 = int_to_ptr.vmem [resolvable:$true] %s412_s30 }
  0x26   : > { %s6615_s5 = sld [smem:[#allocation31_spill]] }
  0x27   : > { %p5726_p1 = pnand %p5099_p13, %p6575_p3 }
  0x29   : > { %s6614_s22 = scalar_select %p5726_p1, 1, 0 }
  0x2a   : > { %p5741_p4 = pneg %p5726_p1 }
  0x2c   : > { %s5260_s20 = scalar_lea.hbm %s6615_s5, 1536 }
  0x2d   : > { %p5261_p2 = scmp.ne.s32.totalorder %s6615_s5, %s5260_s20  ;;  %p5267_p11 = scmp.lt.u32.totalorder %s5260_s20, %s6615_s5 }
  0x2e   : > { %s6616_s12 = scalar_select %p5741_p4, 1, 0 }
  0x2f   : > { %p5263_p6 = pnand %p5741_p4, %p5261_p2 }
  0x31   : > { %p5264_p10 = pneg %p5263_p6 }
  0x33   : > { %p5269_p13 = pnand %p5267_p11, %p5264_p10 }
  0x35   : > { %5272 = shalt.err (!%p5269_p13)
}
  0x36   : > { %s5273_s13 = scalar_lea.vmem %s5719_s21, 1536  ;;  %p5281_p8 = scmp.lt.s32.totalorder %s5719_s21, %s5719_s21 }
  0x37   : > { %p5274_p0 = scmp.ne.s32.totalorder %s5719_s21, %s5273_s13  ;;  %p5282_p7 = scmp.lt.s32.totalorder %s5273_s13, %s5273_s13 }
  0x39   : > { %p5276_p3 = pnand %p5274_p0, %p5741_p4  ;;  %p5283_p2 = por %p5282_p7, %p5281_p8 }
  0x3b   : > { %p5277_p9 = pneg %p5276_p3 }
  0x3d   : > { %p5284_p6 = pnand %p5283_p2, %p5277_p9 }
  0x3f   : > { %5287 = shalt.err (!%p5284_p6)
}
  0x40   : > { %s6578_s24 = smov 128   ;;  %s6580_s27 = smov 8  }
  0x41   : > { %5102 = dma.hbm_to_vmem [thread:$0]  (!%p5726_p1), %s6615_s5, 1536, %s5719_s21, [#allocation10], %s6578_s24, %s6578_s24, %s6580_s27  }
  0x42   : > { %s6617_s7 = sld [smem:[#allocation33_spill]] }
  0x48   : > { %s5288_s13 = scalar_lea.hbm %s6617_s7, 1536 }
  0x49   : > { %p5289_p3 = scmp.ne.s32.totalorder %s6617_s7, %s5288_s13  ;;  %p5295_p9 = scmp.lt.u32.totalorder %s5288_s13, %s6617_s7 }
  0x4b   : > { %p5291_p7 = pnand %p5289_p3, %p5741_p4 }
  0x4d   : > { %p5292_p8 = pneg %p5291_p7 }
  0x4f   : > { %p5297_p0 = pnand %p5295_p9, %p5292_p8 }
  0x51   : > { %5300 = shalt.err (!%p5297_p0)
}
  0x52   : > { %s5301_s21 = scalar_lea.vmem %s5730_s30, 1536  ;;  %p5309_p2 = scmp.lt.s32.totalorder %s5730_s30, %s5730_s30 }
  0x53   : > { %p5302_p10 = scmp.ne.s32.totalorder %s5730_s30, %s5301_s21  ;;  %p5310_p6 = scmp.lt.s32.totalorder %s5301_s21, %s5301_s21 }
  0x55   : > { %p5304_p11 = pnand %p5302_p10, %p5741_p4  ;;  %p5311_p3 = por %p5310_p6, %p5309_p2 }
  0x57   : > { %p5305_p13 = pneg %p5304_p11 }
  0x59   : > { %p5312_p7 = pnand %p5311_p3, %p5305_p13 }
  0x5b   : > { %5315 = shalt.err (!%p5312_p7)
}
  0x5c   : > { %5105 = dma.hbm_to_vmem [thread:$0]  (!%p5726_p1), %s6617_s7, 1536, %s5730_s30, [#allocation13], %s6578_s24, %s6578_s24, %s6580_s27  }
  0x5d   : > { %s6618_s10 = sadd.s32 1, %s5558_s28  ;;  %p5129_p9 = scmp.lt.s32.totalorder %s5562_s0, 2 }
  0x5e   : > { %p51_p8 = scmp.ge.s32.totalorder %s6618_s10, 2  ;;  %s5795_s14 = sand.u32 1, %s5550_s26  }
  0x5f   : > { %s6583_s17 = sand.u32 1, %s5562_s0   ;;  %s6619_s18 = smov %s6618_s10 }
  0x60   : > { %s6660_s18 = smov (%p51_p8, %s6619_s18), 0  ;;  %p5804_p0 = pnand %p5129_p9, %p5695_p5 }
  0x61   : > { %6620 = sst [smem:[#allocation28_spill]] %s6660_s18  ;;  %s74_s23 = ssub.s32 %s5558_s28, %s6660_s18 }
  0x62   : > { %s6621_s20 = scalar_select %p5804_p0, 1, 0 }
  0x63   : > { %s5811_s30 = sshll.u32 %s5795_s14, 5  ;;  %p75_p10 = scmp.eq.s32.totalorder %s74_s23, 0 }
  0x64   : > { %s5814_s13 = sshll.u32 %s5558_s28, 9  ;;  %s6622_s21 = sadd.s32 1, %s5550_s26 }
  0x65   : > { %s5819_s6 = scalar_select %p75_p10, %s5550_s26, %s6622_s21  }
  0x66   : > { %s6624_s2 = sld [smem:[#allocation30_spill]]  ;;  %s473_s24 = scalar_lea.vmem [#allocation6], %s5811_s30 }
  0x67   : > { %6623 = sst [smem:[#allocation29_spill]] %s5819_s6  ;;  %s482_s27 = sshll.u32 %s473_s24, 4  ;;  %s5828_s27 = int_to_ptr.vmem [resolvable:$true] %s482_s27 }
  0x68   : > { %s5832_s23 = scalar_lea.sflag [#allocation7], %s6583_s17  ;;  %p5838_p11 = pneg %p5804_p0 }
  0x6c   : > { %s5825_s15 = scalar_lea.hbm %s6624_s2, %s5814_s13  ;;  %s5321_s24 = scalar_lea.hbm %s6624_s2, 1024 }
  0x6d   : > { %s5316_s5 = scalar_lea.hbm %s5825_s15, 512  ;;  %p5322_p6 = scmp.lt.u32.totalorder %s5825_s15, %s6624_s2 }
  0x6e   : > { %p5317_p5 = scmp.ne.s32.totalorder %s5825_s15, %s5316_s5  ;;  %p5323_p3 = scmp.lt.u32.totalorder %s5321_s24, %s5316_s5 }
  0x6f   : > { %p5325_p8 = scmp.lt.u32.totalorder %s5316_s5, %s5825_s15 }
  0x70   : > { %p5319_p13 = pnand %p5838_p11, %p5317_p5  ;;  %p5324_p7 = por %p5323_p3, %p5322_p6 }
  0x72   : > { %p5320_p2 = pneg %p5319_p13  ;;  %p5326_p9 = por %p5325_p8, %p5324_p7 }
  0x74   : > { %p5327_p10 = pnand %p5326_p9, %p5320_p2 }
  0x76   : > { %5330 = shalt.err (!%p5327_p10)
}
  0x77   : > { %s5331_s17 = scalar_lea.vmem %s5828_s27, 512  ;;  %s5568_s8 = smov [#allocation6]  }
  0x78   : > { %p5332_p5 = scmp.ne.s32.totalorder %s5828_s27, %s5331_s17  ;;  %s5336_s10 = sshll.u32 %s5568_s8, 4  ;;  %s5337_s10 = int_to_ptr.vmem [resolvable:$false] %s5336_s10 }
  0x79   : > { %s5338_s7 = scalar_lea.vmem %s5337_s10, 1024  ;;  %p5339_p1 = scmp.lt.s32.totalorder %s5828_s27, %s5337_s10 }
  0x7a   : > { %p5334_p13 = pnand %p5332_p5, %p5838_p11  ;;  %p5340_p4 = scmp.lt.s32.totalorder %s5338_s7, %s5331_s17 }
  0x7c   : > { %p5335_p12 = pneg %p5334_p13  ;;  %p5341_p6 = por %p5340_p4, %p5339_p1 }
  0x7e   : > { %p5342_p3 = pnand %p5341_p6, %p5335_p12 }
  0x80   : > { %5345 = shalt.err (!%p5342_p3)
}
  0x81   : > { %s6626_s5 = smov 8   ;;  %s6627_s18 = smov 128  }
  0x82   : > { %5115 = dma.hbm_to_vmem [thread:$0]  (!%p5804_p0), %s5825_s15, 512, %s5828_s27, %s5832_s23, %s6627_s18, %s6627_s18, %s6626_s5  }
  0x83   : > { %s5569_s24 = smov [#allocation14]   ;;  %s4476_s2 = sshll.u32 %s5795_s14, 3 }
  0x84   : > { %s434_s8 = sshll.u32 %s5569_s24, 4  ;;  %s5346_s7 = scalar_lea.hbm %s6567_s11, 512  ;;  %s435_s8 = int_to_ptr.vmem [resolvable:$true] %s434_s8 }
  0x85   : > { %p5347_p12 = scmp.ne.s32.totalorder %s6567_s11, %s5346_s7  ;;  %p6628_p1 = scmp.ne.s32.totalorder %s6616_s12, 0 }
  0x86   : > { %p5353_p7 = scmp.lt.u32.totalorder %s5346_s7, %s6567_s11 }
  0x87   : > { %p5349_p4 = pnand %p5347_p12, %p6628_p1 }
  0x89   : > { %p5350_p2 = pneg %p5349_p4 }
  0x8b   : > { %p5355_p8 = pnand %p5353_p7, %p5350_p2 }
  0x8d   : > { %5358 = shalt.err (!%p5355_p8)
}
  0x8e   : > { %s5359_s27 = scalar_lea.vmem %s435_s8, 512  ;;  %p5367_p13 = scmp.lt.s32.totalorder %s435_s8, %s435_s8 }
  0x8f   : > { %p5360_p9 = scmp.ne.s32.totalorder %s435_s8, %s5359_s27  ;;  %p5368_p6 = scmp.lt.s32.totalorder %s5359_s27, %s5359_s27 }
  0x91   : > { %p5362_p10 = pnand %p5360_p9, %p6628_p1  ;;  %p5369_p3 = por %p5368_p6, %p5367_p13 }
  0x93   : > { %p5363_p5 = pneg %p5362_p10 }
  0x95   : > { %p5370_p0 = pnand %p5369_p3, %p5363_p5 }
  0x97   : > { %5373 = shalt.err (!%p5370_p0)
}
  0x98   : > { %p6629_p12 = scmp.ne.s32.totalorder %s6614_s22, 0  ;;  %s4477_s12 = sshll.u32 %s5558_s28, 7 }
  0x99   : > { %s455_s29 = scalar_lea.vmem [#allocation3], %s4476_s2  ;;  %s5891_s10 = scalar_lea.hbm %s6557_s1, %s4477_s12 }
  0x9a   : > { %5108 = dma.hbm_to_vmem [thread:$0]  (!%p6629_p12), %s6567_s11, 512, %s435_s8, [#allocation13], %s6627_s18, %s6627_s18, %s6626_s5  }
  0x9b   : > { %s462_s6 = sshll.u32 %s455_s29, 4  ;;  %s452_s22 = scalar_lea.sflag [#allocation4], %s5795_s14  ;;  %s463_s6 = int_to_ptr.vmem [resolvable:$true] %s462_s6 }
  0x9c   : > { %s5374_s17 = scalar_lea.hbm %s5891_s10, 128  ;;  %s5379_s2 = scalar_lea.hbm %s6557_s1, 256 }
  0x9d   : > { %p5375_p0 = scmp.ne.s32.totalorder %s5891_s10, %s5374_s17  ;;  %p5380_p2 = scmp.lt.u32.totalorder %s5891_s10, %s6557_s1 }
  0x9e   : > { %p5381_p7 = scmp.lt.u32.totalorder %s5379_s2, %s5374_s17  ;;  %p5383_p9 = scmp.lt.u32.totalorder %s5374_s17, %s5891_s10 }
  0x9f   : > { %p5377_p1 = pnand %p5375_p0, %p5838_p11 }
  0xa0   : > { %p5382_p8 = por %p5381_p7, %p5380_p2 }
  0xa1   : > { %p5378_p4 = pneg %p5377_p1 }
  0xa2   : > { %p5384_p10 = por %p5383_p9, %p5382_p8 }
  0xa4   : > { %p5385_p5 = pnand %p5384_p10, %p5378_p4 }
  0xa6   : > { %5388 = shalt.err (!%p5385_p5)
}
  0xa7   : > { %s5389_s14 = scalar_lea.vmem %s463_s6, 128  ;;  %s5570_s26 = smov [#allocation3]  }
  0xa8   : > { %p5390_p13 = scmp.ne.s32.totalorder %s463_s6, %s5389_s14  ;;  %s5394_s12 = sshll.u32 %s5570_s26, 4  ;;  %s5395_s12 = int_to_ptr.vmem [resolvable:$false] %s5394_s12 }
  0xa9   : > { %s5396_s29 = scalar_lea.vmem %s5395_s12, 256  ;;  %p5397_p12 = scmp.lt.s32.totalorder %s463_s6, %s5395_s12 }
  0xaa   : > { %p5392_p6 = pnand %p5390_p13, %p5838_p11  ;;  %p5398_p0 = scmp.lt.s32.totalorder %s5396_s29, %s5389_s14 }
  0xac   : > { %p5393_p3 = pneg %p5392_p6  ;;  %p5399_p1 = por %p5398_p0, %p5397_p12 }
  0xae   : > { %p5400_p2 = pnand %p5399_p1, %p5393_p3 }
  0xb0   : > { %5403 = shalt.err (!%p5400_p2)
}
  0xb1   : > { %p6630_p7 = scmp.ne.s32.totalorder %s6621_s20, 0  ;;  %s5915_s17 = scalar_lea.hbm %s6559_s3, %s5814_s13 }
  0xb2   : > { %s496_s8 = scalar_lea.vmem [#allocation8], %s5811_s30  ;;  %s5924_s9 = scalar_lea.hbm %s6560_s4, %s5814_s13 }
  0xb3   : > { %5112 = dma.hbm_to_vmem [thread:$0]  (!%p6630_p7), %s5891_s10, 128, %s463_s6, %s452_s22  }
  0xb4   : > { %s505_s7 = sshll.u32 %s496_s8, 4  ;;  %s5404_s14 = scalar_lea.hbm %s5915_s17, 512  ;;  %s5918_s7 = int_to_ptr.vmem [resolvable:$true] %s505_s7 }
  0xb5   : > { %p5405_p4 = scmp.ne.s32.totalorder %s5915_s17, %s5404_s14  ;;  %s5409_s22 = scalar_lea.hbm %s6559_s3, 1024 }
  0xb6   : > { %p5410_p10 = scmp.lt.u32.totalorder %s5915_s17, %s6559_s3  ;;  %p5411_p5 = scmp.lt.u32.totalorder %s5409_s22, %s5404_s14 }
  0xb7   : > { %p5407_p8 = pnand %p5405_p4, %p5838_p11  ;;  %p5413_p6 = scmp.lt.u32.totalorder %s5404_s14, %s5915_s17 }
  0xb8   : > { %p5412_p13 = por %p5411_p5, %p5410_p10 }
  0xb9   : > { %p5408_p9 = pneg %p5407_p8 }
  0xba   : > { %p5414_p3 = por %p5413_p6, %p5412_p13 }
  0xbc   : > { %p5415_p12 = pnand %p5414_p3, %p5408_p9 }
  0xbe   : > { %5418 = shalt.err (!%p5415_p12)
}
  0xbf   : > { %s5419_s13 = scalar_lea.vmem %s5918_s7, 512  ;;  %s5571_s29 = smov [#allocation8]  }
  0xc0   : > { %p5420_p0 = scmp.ne.s32.totalorder %s5918_s7, %s5419_s13  ;;  %s5424_s15 = sshll.u32 %s5571_s29, 4  ;;  %s5425_s15 = int_to_ptr.vmem [resolvable:$false] %s5424_s15 }
  0xc1   : > { %s5426_s24 = scalar_lea.vmem %s5425_s15, 1024  ;;  %p5427_p4 = scmp.lt.s32.totalorder %s5918_s7, %s5425_s15 }
  0xc2   : > { %p5422_p1 = pnand %p5420_p0, %p5838_p11  ;;  %p5428_p8 = scmp.lt.s32.totalorder %s5426_s24, %s5419_s13 }
  0xc4   : > { %p5423_p2 = pneg %p5422_p1  ;;  %p5429_p10 = por %p5428_p8, %p5427_p4 }
  0xc6   : > { %p5430_p5 = pnand %p5429_p10, %p5423_p2 }
  0xc8   : > { %5433 = shalt.err (!%p5430_p5)
}
  0xc9   : > { %5118 = dma.hbm_to_vmem [thread:$0]  (!%p6630_p7), %s5915_s17, 512, %s5918_s7, %s5832_s23, %s6627_s18, %s6627_s18, %s6626_s5  }
  0xca   : > { %s519_s8 = scalar_lea.vmem [#allocation9], %s5811_s30  ;;  %s6631_s27 = sand.u32 1, %s5562_s0  }
  0xcb   : > { %s528_s2 = sshll.u32 %s519_s8, 4  ;;  %s5956_s14 = scalar_lea.sflag [#allocation10], %s6631_s27  ;;  %s5952_s2 = int_to_ptr.vmem [resolvable:$true] %s528_s2 }
  0xcc   : > { %s5434_s6 = scalar_lea.hbm %s5924_s9, 512  ;;  %s5439_s26 = scalar_lea.hbm %s6560_s4, 1024 }
  0xcd   : > { %p5435_p9 = scmp.ne.s32.totalorder %s5924_s9, %s5434_s6  ;;  %p5440_p3 = scmp.lt.u32.totalorder %s5924_s9, %s6560_s4 }
  0xce   : > { %p5441_p12 = scmp.lt.u32.totalorder %s5439_s26, %s5434_s6  ;;  %p5443_p1 = scmp.lt.u32.totalorder %s5434_s6, %s5924_s9 }
  0xcf   : > { %p5437_p13 = pnand %p5435_p9, %p5838_p11 }
  0xd0   : > { %p5442_p0 = por %p5441_p12, %p5440_p3 }
  0xd1   : > { %p5438_p6 = pneg %p5437_p13 }
  0xd2   : > { %p5444_p2 = por %p5443_p1, %p5442_p0 }
  0xd4   : > { %p5445_p4 = pnand %p5444_p2, %p5438_p6 }
  0xd6   : > { %5448 = shalt.err (!%p5445_p4)
}
  0xd7   : > { %s5449_s30 = scalar_lea.vmem %s5952_s2, 512  ;;  %s5572_s23 = smov [#allocation9]  }
  0xd8   : > { %p5450_p8 = scmp.ne.s32.totalorder %s5952_s2, %s5449_s30  ;;  %s5454_s17 = sshll.u32 %s5572_s23, 4  ;;  %s5455_s17 = int_to_ptr.vmem [resolvable:$false] %s5454_s17 }
  0xd9   : > { %s5456_s7 = scalar_lea.vmem %s5455_s17, 1024  ;;  %p5457_p9 = scmp.lt.s32.totalorder %s5952_s2, %s5455_s17 }
  0xda   : > { %p5452_p10 = pnand %p5450_p8, %p5838_p11  ;;  %p5458_p13 = scmp.lt.s32.totalorder %s5456_s7, %s5449_s30 }
  0xdc   : > { %p5453_p5 = pneg %p5452_p10  ;;  %p5459_p3 = por %p5458_p13, %p5457_p9 }
  0xde   : > { %p5460_p12 = pnand %p5459_p3, %p5453_p5 }
  0xe0   : > { %5463 = shalt.err (!%p5460_p12)
}
  0xe1   : > { %5121 = dma.hbm_to_vmem [thread:$0]  (!%p6630_p7), %s5924_s9, 512, %s5952_s2, %s5956_s14, %s6627_s18, %s6627_s18, %s6626_s5  }
  0xe2   : > { %p6632_p11 = scmp.ne.s32.totalorder %s6613_s19, 0 }
  0xe3   : > { %s5986_s21 = sand.u32 (!%p6632_p11), 1, %s5546_s25   ;;  %p6633_p6 = scmp.ne.s32.totalorder (!%p6632_p11), %s6608_s16, 0 }
  0xe4   : > { %540 = sbr.rel (%p6632_p11) target bundleno = 3418 (0xd5a), region = 72  ;;  %s4488_s29 = sshll.u32 (!%p6632_p11), %s5986_s21, 3 }
  0xe5   : > { %s543_s15 = scalar_lea.sflag (!%p6632_p11), [#allocation4], %s5986_s21  ;;  %s5990_s24 = scalar_lea.vmem (!%p6632_p11), [#allocation3], %s4488_s29 }
  0xeb   : > { %5517 = dma.done.wait (%p6633_p6), %s543_s15, 128  }
  0xec   : > { %5519 = vsyncadd (%p6633_p6), %s543_s15, 4294967168  ;;  %s6634_s20 = sld [smem:[#allocation25_spill]]  ;;  %s5998_s5 = sshll.u32 %s5986_s21, 5 }
  0xed   : > { %s6001_s9 = scalar_lea.vmem [#allocation6], %s5998_s5 }
  0xf2   : > { %s551_s19 = sand.u32 1, %s6634_s20  }
  0xf3   : > { %s552_s18 = scalar_lea.sflag [#allocation7], %s551_s19 }
  0xf4   : > { %5521 = dma.done.wait (%p6633_p6), %s552_s18, 1024  }
  0xf5   : > { %5523 = vsyncadd (%p6633_p6), %s552_s18, 4294966272  ;;  %s6008_s8 = scalar_lea.vmem [#allocation8], %s5998_s5  ;;  %s570_s2 = scalar_lea.sflag [#allocation10], %s551_s19 }
  0xf6   : > { %s6011_s27 = scalar_lea.vmem [#allocation9], %s5998_s5 }
  0xf7   : > { %5525 = dma.done.wait (%p6633_p6), %s570_s2, 512  }
  0xf8   : > { %5527 = vsyncadd (%p6633_p6), %s570_s2, 4294966784  ;;  %p6635_p7 = scmp.eq.s32.totalorder %s6634_s20, 0 }
  0xfa   : > { %5529 = dma.done.wait (%p6635_p7), [#allocation10], 1536   ;;  %p6636_p0 = pmov %p6635_p7 }
  0xfc   : > { %5531 = vsyncadd (%p6636_p0), [#allocation10], 4294965760  ;;  %p6637_p1 = pmov %p6636_p0 }
  0xfd   : > { %p6638_p2 = pmov %p6636_p0 }
  0xfe   : > { %5533 = dma.done.wait (%p6637_p1), [#allocation13], 2048  }
  0xff   : > { %5535 = vsyncadd (%p6638_p2), [#allocation13], 4294965248  ;;  %v683_v0 = vld [vmem:[#allocation11] sm:$0xff]  ;;  %v684_v1 = vld [vmem:[#allocation11 + $0x8] sm:$0xff]  ;;  %vm678_vm0 = vcmask 1041408   ;;  %vm797_vm1 = vcmask 1040384  }
 0x100   : > { %v803_v2 = vld [vmem:[#allocation11 + $0x20] sm:$0xff]  ;;  %v4989_v3 = vpack.c.bf16 %v684_v1, %v683_v0  ;;  %v804_v4 = vld [vmem:[#allocation11 + $0x28] sm:$0xff]  ;;  %v685_v5 = vld [vmem:[#allocation11 + $0x10] sm:$0xff]  ;;  %vm687_vm2 = vcmask 261120   ;;  %s6639_s6 = sld [smem:[#allocation35_spill]]  ;;  %vm5574_vm3 = vmmov 0  }
 0x101   : > { %v686_v6 = vld [vmem:[#allocation11 + $0x18] sm:$0xff]  ;;  %v4997_v7 = vpack.c.bf16 %v804_v4, %v803_v2  ;;  %v805_v9 = vld [vmem:[#allocation11 + $0x30] sm:$0xff]  ;;  %v6026_v11 = vld [vmem:[%s6001_s9] sm:$0xff]  ;;  %s6640_s7 = sld [smem:[#allocation32_spill]]  ;;  %s6641_s20 = sld [smem:[#allocation34_spill]]  ;;  %vm1467_vm4 = vcmask 64512  }
 0x102   : > { %v4993_v8 = vpack.c.bf16 %v686_v6, %v685_v5  ;;  %v806_v10 = vld [vmem:[#allocation11 + $0x38] sm:$0xff]  ;;  %4990 = vmatprep.subr.bf16.mxu1 %v4989_v3  ;;  %v670_v13 = vrot.slane %v6026_v11, 6  ;;  %v789_v14 = vrot.slane %v6026_v11, 7  ;;  %v6031_v15 = vld [vmem:[%s6001_s9 + $0x8] sm:$0xff]  ;;  %v909_v16 = vld [vmem:[#allocation11 + $0x40] sm:$0xff]  ;;  %s5577_s2 = smov 104  }
 0x103   : > { %v5001_v12 = vpack.c.bf16 %v806_v10, %v805_v9  ;;  %v910_v17 = vld [vmem:[#allocation11 + $0x48] sm:$0xff]  ;;  %4998 = vmatprep.subr.bf16.mxu0 %v4997_v7  ;;  %4992 = vmatpush3.bf16.msra.mxu1 %v4989_v3  ;;  %v671_v18 = vrot.slane %v6031_v15, 6  ;;  %v1033_v19 = vld [vmem:[#allocation12] sm:$0xff]  ;;  %v6035_v21 = vld [vmem:[%s6001_s9 + $0x10] sm:$0xff]  ;;  %v790_v24 = vrot.slane %v6031_v15, 7  ;;  %s5579_s16 = smov 16  }
 0x104   : > { %v1034_v20 = vld [vmem:[#allocation12 + $0x8] sm:$0xff]  ;;  %5000 = vmatpush3.bf16.msra.mxu0 %v4997_v7  ;;  %4994 = vmatprep.subr.bf16.mxu1 %v4993_v8  ;;  %v679_v22 = vsel %vm678_vm0, 0.0, %v670_v13  ;;  %v798_v23 = vsel %vm797_vm1, 0.0, %v789_v14  ;;  %v6041_v26 = vld [vmem:[%s6001_s9 + $0x18] sm:$0xff]  ;;  %v5005_v27 = vpack.c.bf16 %v910_v17, %v909_v16  ;;  %v672_v28 = vrot.slane %v6035_v21, 6  ;;  %v911_v30 = vld [vmem:[#allocation11 + $0x50] sm:$0xff] }
 0x105   : > { %v5013_v25 = vpack.c.bf16 %v1034_v20, %v1033_v19  ;;  %5002 = vmatprep.subr.bf16.mxu0 %v5001_v12  ;;  %4725 = vmatprep.mubr.msk.f32.mxu1 %vm687_vm2, %v679_v22  ;;  %v791_v29 = vrot.slane %v6035_v21, 7  ;;  %v912_v31 = vld [vmem:[#allocation11 + $0x58] sm:$0xff]  ;;  %v680_v32 = vsel %vm678_vm0, 0.0, %v671_v18  ;;  %v673_v33 = vrot.slane %v6041_v26, 6  ;;  %v1035_v34 = vld [vmem:[#allocation12 + $0x10] sm:$0xff]  ;;  %v6050_v36 = vld [vmem:[%s6008_s8] sm:$0xff] }
 0x106   : > { %4739 = vmatprep.mubr.msk.f32.mxu0 %vm687_vm2, %v798_v23  ;;  %v1036_v35 = vld [vmem:[#allocation12 + $0x18] sm:$0xff]  ;;  %v799_v37 = vsel %vm797_vm1, 0.0, %v790_v24  ;;  %v792_v38 = vrot.slane %v6041_v26, 7  ;;  %v6055_v39 = vld [vmem:[%s6008_s8 + $0x8] sm:$0xff]  ;;  %v681_v40 = vsel %vm678_vm0, 0.0, %v672_v28  ;;  %v5009_v41 = vpack.c.bf16 %v912_v31, %v911_v30  ;;  %v1151_v45 = vld [vmem:[#allocation12 + $0x20] sm:$0xff] }
 0x107   : > { %4996 = vmatpush3.bf16.msra.mxu1 %v4993_v8  ;;  %v800_v42 = vsel %vm797_vm1, 0.0, %v791_v29  ;;  %v5017_v43 = vpack.c.bf16 %v1036_v35, %v1035_v34  ;;  %v1021_v44 = vrot.slane %v6050_v36, 6  ;;  %v1152_v46 = vld [vmem:[#allocation12 + $0x28] sm:$0xff]  ;;  %v653_v47 = vld [vmem:[%s6008_s8 + $0x10] sm:$0xff]  ;;  %v682_v48 = vsel %vm678_vm0, 0.0, %v673_v33  ;;  %v654_v51 = vld [vmem:[%s6008_s8 + $0x18] sm:$0xff] }
 0x108   : > { %5004 = vmatpush3.bf16.msra.mxu0 %v5001_v12  ;;  %5014 = vmatprep.subr.bf16.mxu1 %v5013_v25  ;;  %v1022_v49 = vrot.slane %v6055_v39, 6  ;;  %v801_v50 = vsel %vm797_vm1, 0.0, %v792_v38  ;;  %v5021_v52 = vpack.c.bf16 %v1152_v46, %v1151_v45  ;;  %v1023_v53 = vrot.slane %v653_v47, 6  ;;  %v1153_v55 = vld [vmem:[#allocation12 + $0x30] sm:$0xff]  ;;  %v1154_v56 = vld [vmem:[#allocation12 + $0x38] sm:$0xff]  ;;  %v1257_v62 = vld [vmem:[#allocation12 + $0x40] sm:$0xff] }
 0x109   : > { %5006 = vmatprep.subr.bf16.mxu0 %v5005_v27  ;;  %v1029_v54 = vsel %vm678_vm0, 0.0, %v1021_v44  ;;  %v1024_v58 = vrot.slane %v654_v51, 6  ;;  %v5025_v60 = vpack.c.bf16 %v1154_v56, %v1153_v55  ;;  %v1138_v61 = vrot.slane %v6050_v36, 7  ;;  %v1258_v63 = vld [vmem:[#allocation12 + $0x48] sm:$0xff]  ;;  %v1259_v5 = vld [vmem:[#allocation12 + $0x50] sm:$0xff]  ;;  %v1260_v6 = vld [vmem:[#allocation12 + $0x58] sm:$0xff] }
 0x10a   : > { %4726 = vmatmul.mubr.msk.f32.vlgmr.msra.gmra.mrb[0].mxu1 %vm687_vm2, %v680_v32  ;;  %v1030_v57 = vsel %vm678_vm0, 0.0, %v1022_v49  ;;  %v1031_v59 = vsel %vm678_vm0, 0.0, %v1023_v53  ;;  %v1139_v1 = vrot.slane %v6055_v39, 7  ;;  %v5029_v2 = vpack.c.bf16 %v1258_v63, %v1257_v62  ;;  %v1358_v12 = vld [vmem:[%s6639_s6] sm:$0xff]  ;;  %v1359_v13 = vld [vmem:[%s6639_s6 + $0x8] sm:$0xff]  ;;  %v1360_v14 = vld [vmem:[%s6639_s6 + $0x10] sm:$0xff] }
 0x10b   : > { %4740 = vmatmul.mubr.msk.f32.vlgmr.msra.gmra.mrb[0].mxu0 %vm687_vm2, %v799_v37  ;;  %5016 = vmatpush3.bf16.msra.mxu1 %v5013_v25  ;;  %v1032_v0 = vsel %vm678_vm0, 0.0, %v1024_v58  ;;  %v1140_v3 = vrot.slane %v653_v47, 7  ;;  %v1146_v4 = vsel %vm797_vm1, 0.0, %v1138_v61  ;;  %v1141_v8 = vrot.slane %v654_v51, 7  ;;  %v1361_v16 = vld [vmem:[%s6639_s6 + $0x18] sm:$0xff]  ;;  %v655_v18 = vld [vmem:[%s6011_s27] sm:$0xff] }
 0x10c   : > { %5008 = vmatpush3.bf16.msra.mxu0 %v5005_v27  ;;  %4728 = vmatprep.mubr.msk.f32.mxu1 %vm687_vm2, %v681_v40  ;;  %v1147_v7 = vsel %vm797_vm1, 0.0, %v1139_v1  ;;  %v5033_v10 = vpack.c.bf16 %v1260_v6, %v1259_v5  ;;  %v5041_v17 = vpack.c.bf16 %v1361_v16, %v1360_v14  ;;  %v656_v19 = vld [vmem:[%s6011_s27 + $0x8] sm:$0xff]  ;;  %v5573_v20 = vmov 0.0   ;;  %v658_v22 = vld [vmem:[%s6011_s27 + $0x18] sm:$0xff]  ;;  %v4509_v40 = vld [vmem:[%s6641_s20] ss:$0 sm:$0xff] }
 0x10d   : > { %4742 = vmatprep.mubr.msk.f32.mxu0 %vm687_vm2, %v800_v42  ;;  %5010 = vmatprep.subr.bf16.mxu0 %v5009_v41  ;;  %v1148_v9 = vsel %vm797_vm1, 0.0, %v1140_v3  ;;  %s6642_s9 = sld [smem:[#allocation36_spill]]  ;;  %v6195_v58 = vld [vmem:[%s5990_s24] sm:$0xff]  ;;  %s5575_s24 = smov 120   ;;  %vm4144_vm5 = vcmask 130048   ;;  %vm4149_vm6 = vcmask 195584  }
 0x10e   : > { %4729 = vmatmul.mubr.msk.f32.gmra.mrb[2].mxu1 %vm687_vm2, %v682_v48  ;;  %5018 = vmatprep.subr.bf16.mxu1 %v5017_v43  ;;  %s5576_s8 = smov 112   ;;  %s5580_s14 = smov 24  }
 0x10f   : > { %4743 = vmatmul.mubr.msk.f32.gmra.mrb[2].mxu0 %vm687_vm2, %v801_v50  ;;  %5020 = vmatpush3.bf16.msra.mxu1 %v5017_v43  ;;  %s6643_s10 = sld [smem:[#allocation24_spill]]  ;;  %s6644_s12 = sld [smem:[#allocation37_spill]] }
 0x110   : > { %5012 = vmatpush3.bf16.msra.mxu0 %v5009_v41  ;;  %4753 = vmatprep.mubr.msk.f32.mxu0 %vm687_vm2, %v6026_v11  ;;  %v1149_v11 = vsel %vm797_vm1, 0.0, %v1141_v8  ;;  %s642_s13 = scalar_lea.vmem [#allocation15], %s5998_s5  ;;  %s6645_s30 = sld [smem:[#allocation26_spill]] }
 0x111   : > { %4767 = vmatprep.mubr.msk.f32.mxu1 %vm687_vm2, %v1029_v54  ;;  %5022 = vmatprep.subr.bf16.mxu1 %v5021_v52  ;;  %s4282_s23 = sshll.u32 %s642_s13, 4  ;;  %s6646_s15 = sld [smem:[#allocation38_spill]]  ;;  %s6499_s23 = int_to_ptr.vmem [resolvable:$true] %s4282_s23 }
 0x112   : > { %4768 = vmatmul.mubr.msk.f32.vlgmr.msra.gmra.mrb[4].mxu1 %vm687_vm2, %v1030_v57  ;;  %s4267_s20 = scalar_lea.sflag [#allocation5], %s5986_s21  ;;  %s5464_s19 = scalar_lea.vmem %s6499_s23, 512 }
 0x113   : > { %4754 = vmatmul.mubr.msk.f32.vlgmr.msra.gmra.mrb[0].mxu0 %vm687_vm2, %v6031_v15  ;;  %5024 = vmatpush3.bf16.msra.mxu1 %v5021_v52  ;;  %v5037_v15 = vpack.c.bf16 %v1359_v13, %v1358_v12  ;;  %v4522_v49 = vld [vmem:[%s6642_s9] ss:$0 sm:$0xff]  ;;  %p5465_p4 = scmp.ne.s32.totalorder %s6499_s23, %s5464_s19  ;;  %s5581_s18 = smov [#allocation15]  }
 0x114   : > { %4756 = vmatprep.mubr.msk.f32.mxu0 %vm687_vm2, %v6035_v21  ;;  %4770 = vmatprep.mubr.msk.f32.mxu1 %vm687_vm2, %v1031_v59  ;;  %v657_v21 = vld [vmem:[%s6011_s27 + $0x10] sm:$0xff]  ;;  %s5578_s27 = smov 8   ;;  %s5468_s9 = sshll.u32 %s5581_s18, 4  ;;  %s5469_s9 = int_to_ptr.vmem [resolvable:$false] %s5468_s9 }
 0x115   : > { %5026 = vmatprep.subr.bf16.mxu1 %v5025_v60  ;;  %5038 = vmatprep.subr.bf16.mxu0 %v5037_v15  ;;  %s4588_s17 = sshll.u32 %s6643_s10, 9  ;;  %p5471_p9 = scmp.lt.s32.totalorder %s6499_s23, %s5469_s9 }
 0x116   : > { %4771 = vmatmul.mubr.msk.f32.gmra.mrb[6].mxu1 %vm687_vm2, %v1032_v0  ;;  %5040 = vmatpush3.bf16.msra.mxu0 %v5037_v15  ;;  %p6647_p8 = scmp.ne.s32.totalorder %s6645_s30, 0 }
 0x117   : > { %4757 = vmatmul.mubr.msk.f32.gmra.mrb[2].mxu0 %vm687_vm2, %v6041_v26  ;;  %5028 = vmatpush3.bf16.msra.mxu1 %v5025_v60  ;;  %v4496_v26 = vld [vmem:[%s6640_s7] ss:$0 sm:$0xff]  ;;  %s6504_s5 = scalar_lea.hbm %s6646_s15, %s4588_s17 }
 0x118   : > { %4781 = vmatprep.mubr.msk.f32.mxu1 %vm687_vm2, %v1146_v4  ;;  %5030 = vmatprep.subr.bf16.mxu1 %v5029_v2  ;;  %p5466_p10 = pnand %p5465_p4, %p6647_p8 }
 0x119   : > { %5042 = vmatprep.subr.bf16.mxu0 %v5041_v17  ;;  %4809 = vmatprep.mubr.msk.f32.mxu0 %vm687_vm2, %v655_v18 }
 0x11a   : > { %4782 = vmatmul.mubr.msk.f32.vlgmr.msra.gmra.mrb[4].mxu1 %vm687_vm2, %v1147_v7  ;;  %5044 = vmatpush3.bf16.msra.mxu0 %v5041_v17  ;;  %p5467_p5 = pneg %p5466_p10 }
 0x11b   : > { %5032 = vmatpush3.bf16.msra.mxu1 %v5029_v2  ;;  %4784 = vmatprep.mubr.msk.f32.mxu1 %vm687_vm2, %v1148_v9 }
 0x11c   : > { %5034 = vmatprep.subr.bf16.mxu1 %v5033_v10  ;;  %4825 = vmatprep.subr.mxu0 %v5573_v20 }
 0x11d   : > { %4810 = vmatmul.mubr.msk.f32.vlgmr.msra.gmra.mrb[4].mxu0 %vm687_vm2, %v656_v19 }
 0x11e   : > { %4785 = vmatmul.mubr.msk.f32.gmra.mrb[6].mxu1 %vm687_vm2, %v1149_v11  ;;  %4812 = vmatprep.mubr.msk.f32.mxu0 %vm687_vm2, %v657_v21 }
 0x11f   : > { %5036 = vmatpush3.bf16.msra.mxu1 %v5033_v10  ;;  %4795 = vmatprep.mubr.msk.f32.mxu1 %vm687_vm2, %v6050_v36 }
 0x120   : > { %4815 = vmatprep.subr.mxu1 %v5573_v20 }
 0x121   : > { %4813 = vmatmul.mubr.msk.f32.gmra.mrb[6].mxu0 %vm687_vm2, %v658_v22 }
 0x122   : > { %4796 = vmatmul.mubr.msk.f32.vlgmr.msra.gmra.mrb[4].mxu1 %vm687_vm2, %v6055_v39  ;;  %4827 = vmatprep.mubr.msk.f32.mxu0 %vm5574_vm3, %v5573_v20 }
 0x123   : > { %4798 = vmatprep.mubr.msk.f32.mxu1 %vm687_vm2, %v653_v47 }
 0x126   : > { %4799 = vmatmul.mubr.msk.f32.gmra.mrb[6].mxu1 %vm687_vm2, %v654_v51 }
 0x127   : > { %4817 = vmatprep.mubr.msk.f32.mxu1 %vm5574_vm3, %v5573_v20 }
 0x1dd   : > { %v4727_v23 = vpop.f32.mrb[0].mxu1 }
 0x1de   : > { %v766_v24 = vpop.f32.mrb[1].mxu1  ;;  %v786_v28 = vadd.f32 %v4727_v23, %v4496_v26 }
 0x1df   : > { %v785_v29 = vadd.f32 %v4496_v26, %v766_v24 }
 0x1e1   : > { %v4730_v25 = vpop.f32.mrb[2].mxu1 }
 0x1e2   : > { %v776_v27 = vpop.f32.mrb[3].mxu1  ;;  %v788_v34 = vadd.f32 %v4730_v25, %v4496_v26 }
 0x1e3   : > { %v787_v35 = vadd.f32 %v4496_v26, %v776_v27 }
 0x1e6   : > { %v4755_v30 = vpop.f32.mrb[0].mxu0 }
 0x1e7   : > { %v6132_v31 = vadd.f32 %v4755_v30, %v786_v28  ;;  %v987_v32 = vpop.f32.mrb[1].mxu0 }
 0x1e8   : > { %v6134_v33 = vadd.f32 %v987_v32, %v785_v29 }
 0x1ea   : > { %v4758_v36 = vpop.f32.mrb[2].mxu0 }
 0x1eb   : > { %v6136_v37 = vadd.f32 %v4758_v36, %v788_v34  ;;  %v997_v38 = vpop.f32.mrb[3].mxu0 }
 0x1ec   : > { %v6138_v39 = vadd.f32 %v997_v38, %v787_v35 }
 0x1f0   : > { %v4811_v50 = vpop.f32.mrb[4].mxu0 }
 0x1f1   : > { %v6182_v51 = vadd.f32 %v4811_v50, %v4522_v49  ;;  %v1447_v52 = vpop.f32.mrb[5].mxu0 }
 0x1f2   : > { %v6186_v53 = vadd.f32 %v4522_v49, %v1447_v52 }
 0x1f4   : > { %v4814_v54 = vpop.f32.mrb[6].mxu0 }
 0x1f5   : > { %v4797_v41 = vpop.f32.mrb[4].mxu1  ;;  %v6188_v55 = vadd.f32 %v4814_v54, %v4522_v49  ;;  %v1457_v56 = vpop.f32.mrb[7].mxu0 }
 0x1f6   : > { %v1335_v42 = vpop.f32.mrb[5].mxu1  ;;  %v6148_v46 = vadd.f32 %v4797_v41, %v4509_v40  ;;  %v6190_v57 = vadd.f32 %v4522_v49, %v1457_v56 }
 0x1f7   : > { %v6143_v43 = vadd.f32 %v4509_v40, %v1335_v42 }
 0x1f9   : > { %v4800_v44 = vpop.f32.mrb[6].mxu1  ;;  %4816 = vmatpush3.xpose.msk.msra.mxu1 %vm1467_vm4, %v6143_v43 }
 0x1fa   : > { %v1345_v45 = vpop.f32.mrb[7].mxu1  ;;  %4820 = vmatprep.subr.mxu1 %v5573_v20  ;;  %v6161_v48 = vadd.f32 %v4800_v44, %v4509_v40 }
 0x1fb   : > { %v6150_v47 = vadd.f32 %v4509_v40, %v1345_v45 }
 0x1fc   : > { %4818 = vmatmul.mubr.msk.f32.vlgmr.msra.gmra.mrb[8].mxu1 %vm1467_vm4, %v6134_v33 }
 0x1fd   : > { %4821 = vmatpush3.xpose.msk.msra.mxu1 %vm1467_vm4, %v6148_v46  ;;  %4826 = vmatpush3.xpose.msk.msra.mxu0 %vm1467_vm4, %v6150_v47 }
 0x1fe   : > { %4822 = vmatprep.mubr.msk.f32.mxu1 %vm5574_vm3, %v5573_v20  ;;  %4830 = vmatprep.subr.mxu1 %v5573_v20 }
 0x1ff   : > { %4835 = vmatprep.subr.mxu0 %v5573_v20 }
 0x200   : > { %4823 = vmatmul.mubr.msk.f32.vlgmr.msra.gmra.mrb[10].mxu1 %vm1467_vm4, %v6132_v31  ;;  %4828 = vmatmul.mubr.msk.f32.vlgmr.msra.gmra.mrb[8].mxu0 %vm1467_vm4, %v6138_v39 }
 0x201   : > { %4831 = vmatpush3.xpose.msk.msra.mxu1 %vm1467_vm4, %v6161_v48  ;;  %4832 = vmatprep.mubr.msk.f32.mxu1 %vm5574_vm3, %v5573_v20 }
 0x202   : > { %4840 = vmatprep.subr.mxu1 %v5573_v20  ;;  %4837 = vmatprep.mubr.msk.f32.mxu0 %vm5574_vm3, %v5573_v20 }
 0x203   : > { %4836 = vmatpush3.msra.mxu0 %v6186_v53 }
 0x204   : > { %4833 = vmatmul.mubr.msk.f32.vlgmr.msra.gmra.mrb[12].mxu1 %vm1467_vm4, %v6136_v37  ;;  %4845 = vmatprep.subr.mxu0 %v5573_v20 }
 0x205   : > { %4842 = vmatprep.mubr.msk.f32.mxu1 %vm5574_vm3, %v5573_v20  ;;  %4841 = vmatpush3.msra.mxu1 %v6182_v51 }
 0x206   : > { %4850 = vmatprep.subr.mxu1 %v5573_v20 }
 0x2cf   : > { %v1540_v59 = vpop.f32.mrb[8].mxu1 }
 0x2d0   : > { %v1541_v60 = vadd.f32 %v1540_v59, %v6195_v58  ;;  %v4819_v61 = vpop.f32.mrb[9].mxu1 }
 0x2d2   : > { %v1772_v62 = vsel %vm1467_vm4, %v1541_v60, -inf }
 0x2d3   : > { %1773 = vmax.xlane.f32.xlu0 %v1772_v62  ;;  %v1616_v63 = vpop.f32.mrb[10].mxu1  ;;  %v1692_v0 = vpop.f32.mrb[8].mxu0 }
 0x2d4   : > { %v1617_v1 = vadd.f32 %v1616_v63, %v6195_v58  ;;  %v1693_v2 = vadd.f32 %v1692_v0, %v6195_v58  ;;  %v4824_v3 = vpop.f32.mrb[11].mxu1  ;;  %v4829_v4 = vpop.f32.mrb[9].mxu0 }
 0x2d6   : > { %v1775_v5 = vsel %vm1467_vm4, %v1617_v1, -inf  ;;  %v1778_v6 = vsel %vm1467_vm4, %v1693_v2, -inf }
 0x2d7   : > { %1776 = vmax.xlane.f32.xlu0 %v1775_v5  ;;  %v1768_v7 = vpop.f32.mrb[12].mxu1  ;;  %1779 = vmax.xlane.f32.xlu1 %v1778_v6 }
 0x2d8   : > { %v1769_v8 = vadd.f32 %v1768_v7, %v6195_v58  ;;  %v4834_v9 = vpop.f32.mrb[13].mxu1 }
 0x2da   : > { %v1781_v10 = vsel %vm1467_vm4, %v1769_v8, -inf }
 0x2db   : > { %1782 = vmax.xlane.f32.xlu1 %v1781_v10 }
 0x360   : > { %v1774_v11 = vpop.xlane.xlu0 %1773 }
 0x361   : > { %v1784_v12 = vsub.f32 %v1541_v60, %v1774_v11 }
 0x363   : > { %v1788_v13 = vmul.f32 1.442695, %v1784_v12 }
 0x364   : > { %v1777_v14 = vpop.xlane.xlu0 %1776  ;;  %v1780_v15 = vpop.xlane.xlu1 %1779 }
 0x365   : > { %5196 = vpow2.f32 %v1788_v13  ;;  %v1785_v16 = vsub.f32 %v1617_v1, %v1777_v14  ;;  %v1786_v17 = vsub.f32 %v1693_v2, %v1780_v15 }
 0x367   : > { %v1790_v18 = vmul.f32 1.442695, %v1785_v16  ;;  %v1792_v19 = vmul.f32 1.442695, %v1786_v17 }
 0x368   : > { %v1783_v27 = vpop.xlane.xlu1 %1782 }
 0x369   : > { %5198 = vpow2.f32 %v1790_v18  ;;  %v1787_v28 = vsub.f32 %v1769_v8, %v1783_v27 }
 0x36a   : > { %5200 = vpow2.f32 %v1792_v19 }
 0x36b   : > { %v1794_v29 = vmul.f32 1.442695, %v1787_v28 }
 0x36d   : > { %5202 = vpow2.f32 %v1794_v29 }
 0x36f   : > { %v5197_v21 = vpop.eup %5196 }
 0x370   : > { %v1796_v22 = vsel %vm1467_vm4, %v5197_v21, 0.0 }
 0x371   : > { %1797 = vadd.xlane.f32.xlu0 %v1796_v22 }
 0x373   : > { %v5199_v23 = vpop.eup %5198 }
 0x374   : > { %v5201_v24 = vpop.eup %5200  ;;  %v1799_v25 = vsel %vm1467_vm4, %v5199_v23, 0.0 }
 0x375   : > { %1800 = vadd.xlane.f32.xlu1 %v1799_v25  ;;  %v1802_v26 = vsel %vm1467_vm4, %v5201_v24, 0.0 }
 0x376   : > { %1803 = vadd.xlane.f32.xlu0 %v1802_v26 }
 0x377   : > { %v5203_v30 = vpop.eup %5202 }
 0x378   : > { %v1805_v32 = vsel %vm1467_vm4, %v5203_v30, 0.0 }
 0x386   : > { %2188 = vrot.lane.b32.xlu1 %v6148_v46, %s5575_s24 }
 0x38a   : > { %2108 = vrot.lane.b32.xlu1 %v6134_v33, %s5575_s24 }
 0x38c   : > { %2110 = vrot.lane.b32.xlu0 %v6143_v43, %s5575_s24 }
 0x38e   : > { %2186 = vrot.lane.b32.xlu1 %v6132_v31, %s5575_s24 }
 0x390   : > { %2266 = vrot.lane.b32.xlu0 %v6150_v47, %s5575_s24 }
 0x394   : > { %2264 = vrot.lane.b32.xlu0 %v6138_v39, %s5575_s24 }
 0x3b2   : > { %1806 = vadd.xlane.f32.xlu1 %v1805_v32 }
 0x3c3   : > { %2344 = vrot.lane.b32.xlu1 %v6161_v48, %s5575_s24 }
 0x3c7   : > { %2342 = vrot.lane.b32.xlu1 %v6136_v37, %s5575_s24 }
 0x3fe   : > { %v1798_v34 = vpop.xlane.xlu0 %1797 }
 0x3ff   : > { %5204 = vrcp.f32 %v1798_v34 }
 0x402   : > { %v1801_v35 = vpop.xlane.xlu1 %1800 }
 0x403   : > { %v1804_v36 = vpop.xlane.xlu0 %1803  ;;  %5206 = vrcp.f32 %v1801_v35 }
 0x404   : > { %5208 = vrcp.f32 %v1804_v36 }
 0x406   : > { %v2189_v50 = vpop.permute.xlu1 %2188 }
 0x407   : > { %v2111_v45 = vpop.permute.xlu0 %2110 }
 0x409   : > { %v5205_v38 = vpop.eup %5204 }
 0x40a   : > { %v1812_v40 = vmul.f32 %v5205_v38, %v5197_v21  ;;  %v2109_v54 = vpop.permute.xlu1 %2108 }
 0x40b   : > { %v2267_v52 = vpop.permute.xlu0 %2266 }
 0x40c   : > { %4838 = vmatmul.mubr.msk.f32.vlgmr.msra.gmra.mrb[10].mxu0 %vm1467_vm4, %v1812_v40 }
 0x40d   : > { %v5207_v41 = vpop.eup %5206  ;;  %4846 = vmatpush3.msra.mxu0 %v6190_v57  ;;  %4847 = vmatprep.mubr.msk.f32.mxu0 %vm5574_vm3, %v5573_v20 }
 0x40e   : > { %v5209_v42 = vpop.eup %5208  ;;  %v1813_v44 = vmul.f32 %v5207_v41, %v5199_v23  ;;  %4855 = vmatprep.subr.mxu0 %v5573_v20  ;;  %v2187_v59 = vpop.permute.xlu1 %2186 }
 0x40f   : > { %v1814_v49 = vmul.f32 %v5209_v42, %v5201_v24  ;;  %v2265_v56 = vpop.permute.xlu0 %2264 }
 0x410   : > { %4843 = vmatmul.mubr.msk.f32.vlgmr.msra.gmra.mrb[14].mxu1 %vm1467_vm4, %v1813_v44 }
 0x411   : > { %4848 = vmatmul.mubr.msk.f32.vlgmr.msra.gmra.mrb[12].mxu0 %vm1467_vm4, %v1814_v49  ;;  %4851 = vmatpush3.msra.mxu1 %v6188_v55 }
 0x412   : > { %4857 = vmatprep.mubr.msk.f32.mxu0 %vm5574_vm3, %v5573_v20  ;;  %4852 = vmatprep.mubr.msk.f32.mxu1 %vm5574_vm3, %v5573_v20 }
 0x413   : > { %4860 = vmatprep.subr.mxu1 %v5573_v20 }
 0x414   : > { %4856 = vmatpush3.xpose.msk.msra.mxu0 %vm1467_vm4, %v2111_v45 }
 0x415   : > { %4865 = vmatprep.subr.mxu0 %v5573_v20 }
 0x417   : > { %4858 = vmatmul.mubr.msk.f32.vlgmr.msra.gmra.mrb[14].mxu0 %vm1467_vm4, %v2109_v54 }
 0x418   : > { %4866 = vmatpush3.xpose.msk.msra.mxu0 %vm1467_vm4, %v2267_v52  ;;  %4867 = vmatprep.mubr.msk.f32.mxu0 %vm5574_vm3, %v5573_v20 }
 0x419   : > { %4875 = vmatprep.subr.mxu0 %v5573_v20 }
 0x41b   : > { %4868 = vmatmul.mubr.msk.f32.vlgmr.msra.gmra.mrb[16].mxu0 %vm1467_vm4, %v2265_v56 }
 0x41c   : > { %4877 = vmatprep.mubr.msk.f32.mxu0 %vm5574_vm3, %v5573_v20 }
 0x43f   : > { %v1807_v60 = vpop.xlane.xlu1 %1806 }
 0x440   : > { %5210 = vrcp.f32 %v1807_v60 }
 0x443   : > { %v2345_v63 = vpop.permute.xlu1 %2344 }
 0x447   : > { %v2343_v0 = vpop.permute.xlu1 %2342 }
 0x44a   : > { %v5211_v61 = vpop.eup %5210 }
 0x44b   : > { %v1815_v62 = vmul.f32 %v5211_v61, %v5203_v30 }
 0x44d   : > { %4853 = vmatmul.mubr.msk.f32.vlgmr.msra.gmra.mrb[16].mxu1 %vm1467_vm4, %v1815_v62 }
 0x44e   : > { %4861 = vmatpush3.xpose.msk.msra.mxu1 %vm1467_vm4, %v2189_v50  ;;  %4862 = vmatprep.mubr.msk.f32.mxu1 %vm5574_vm3, %v5573_v20 }
 0x44f   : > { %4870 = vmatprep.subr.mxu1 %v5573_v20 }
 0x451   : > { %4863 = vmatmul.mubr.msk.f32.vlgmr.msra.gmra.mrb[18].mxu1 %vm1467_vm4, %v2187_v59 }
 0x452   : > { %4871 = vmatpush3.xpose.msk.msra.mxu1 %vm1467_vm4, %v2345_v63  ;;  %4872 = vmatprep.mubr.msk.f32.mxu1 %vm5574_vm3, %v5573_v20 }
 0x453   : > { %4880 = vmatprep.subr.mxu1 %v5573_v20 }
 0x455   : > { %4873 = vmatmul.mubr.msk.f32.vlgmr.msra.gmra.mrb[20].mxu1 %vm1467_vm4, %v2343_v0 }
 0x456   : > { %4882 = vmatprep.mubr.msk.f32.mxu1 %vm5574_vm3, %v5573_v20 }
 0x4df   : > { %v6261_v1 = vpop.f32.mrb[10].mxu0 }
 0x4e0   : > { %v4839_v2 = vpop.f32.mrb[11].mxu0 }
 0x4e3   : > { %v6263_v3 = vpop.f32.mrb[14].mxu1 }
 0x4e4   : > { %v6265_v4 = vpop.f32.mrb[12].mxu0  ;;  %v4844_v5 = vpop.f32.mrb[15].mxu1 }
 0x4e5   : > { %v4849_v6 = vpop.f32.mrb[13].mxu0 }
 0x4ea   : > { %v2182_v7 = vpop.f32.mrb[14].mxu0 }
 0x4eb   : > { %v2183_v8 = vadd.f32 %v2182_v7, %v6195_v58  ;;  %v4859_v9 = vpop.f32.mrb[15].mxu0 }
 0x4ed   : > { %v2420_v10 = vsel %vm1467_vm4, %v2183_v8, -inf }
 0x4ee   : > { %2421 = vmax.xlane.f32.xlu0 %v2420_v10  ;;  %v2338_v11 = vpop.f32.mrb[16].mxu0 }
 0x4ef   : > { %v2339_v12 = vadd.f32 %v2338_v11, %v6195_v58  ;;  %v4869_v13 = vpop.f32.mrb[17].mxu0 }
 0x4f1   : > { %v2426_v14 = vsel %vm1467_vm4, %v2339_v12, -inf }
 0x4f2   : > { %2427 = vmax.xlane.f32.xlu0 %v2426_v14 }
 0x520   : > { %v6271_v15 = vpop.f32.mrb[16].mxu1 }
 0x521   : > { %v4854_v16 = vpop.f32.mrb[17].mxu1 }
 0x524   : > { %v2260_v17 = vpop.f32.mrb[18].mxu1 }
 0x525   : > { %v2261_v18 = vadd.f32 %v2260_v17, %v6195_v58  ;;  %v4864_v19 = vpop.f32.mrb[19].mxu1 }
 0x527   : > { %v2423_v21 = vsel %vm1467_vm4, %v2261_v18, -inf }
 0x528   : > { %2424 = vmax.xlane.f32.xlu1 %v2423_v21  ;;  %v2416_v22 = vpop.f32.mrb[20].mxu1 }
 0x529   : > { %v2417_v23 = vadd.f32 %v2416_v22, %v6195_v58  ;;  %v4874_v24 = vpop.f32.mrb[21].mxu1 }
 0x52b   : > { %v2429_v25 = vsel %vm1467_vm4, %v2417_v23, -inf }
 0x52c   : > { %2430 = vmax.xlane.f32.xlu0 %v2429_v25 }
 0x539   : > { %2542 = vrot.lane.b32.xlu1 %v6182_v51, %s5575_s24 }
 0x53d   : > { %2619 = vrot.lane.b32.xlu1 %v6190_v57, %s5575_s24 }
 0x541   : > { %2696 = vrot.lane.b32.xlu1 %v6188_v55, %s5575_s24 }
 0x542   : > { %2465 = vrot.lane.b32.xlu0 %v6186_v53, %s5575_s24  ;;  %s5470_s24 = scalar_lea.vmem %s5469_s9, 1024 }
 0x543   : > { %p5472_p13 = scmp.lt.s32.totalorder %s5470_s24, %s5464_s19 }
 0x545   : > { %2852 = vrot.lane.b32.xlu1 %v6148_v46, %s5576_s8  ;;  %p5473_p3 = por %p5472_p13, %p5471_p9 }
 0x546   : > { %2774 = vrot.lane.b32.xlu0 %v6143_v43, %s5576_s8 }
 0x547   : > { %p5474_p12 = pnand %p5473_p3, %p5467_p5 }
 0x57b   : > { %v2422_v26 = vpop.xlane.xlu0 %2421 }
 0x57c   : > { %v2432_v27 = vsub.f32 %v2183_v8, %v2422_v26 }
 0x57e   : > { %v2436_v28 = vmul.f32 1.442695, %v2432_v27 }
 0x57f   : > { %v2428_v29 = vpop.xlane.xlu0 %2427 }
 0x580   : > { %5212 = vpow2.f32 %v2436_v28  ;;  %v2434_v30 = vsub.f32 %v2339_v12, %v2428_v29 }
 0x582   : > { %v2440_v32 = vmul.f32 1.442695, %v2434_v30 }
 0x584   : > { %5214 = vpow2.f32 %v2440_v32 }
 0x58a   : > { %v5213_v34 = vpop.eup %5212 }
 0x58b   : > { %v2444_v35 = vsel %vm1467_vm4, %v5213_v34, 0.0 }
 0x58c   : > { %2445 = vadd.xlane.f32.xlu0 %v2444_v35 }
 0x58e   : > { %v5215_v36 = vpop.eup %5214 }
 0x58f   : > { %v2450_v38 = vsel %vm1467_vm4, %v5215_v36, 0.0 }
 0x590   : > { %2451 = vadd.xlane.f32.xlu0 %v2450_v38 }
 0x5a6   : > { %2772 = vrot.lane.b32.xlu0 %v6134_v33, %s5576_s8 }
 0x5aa   : > { %2930 = vrot.lane.b32.xlu0 %v6150_v47, %s5576_s8 }
 0x5ae   : > { %2928 = vrot.lane.b32.xlu0 %v6138_v39, %s5576_s8 }
 0x5b2   : > { %3128 = vrot.lane.b32.xlu0 %v6186_v53, %s5576_s8 }
 0x5b5   : > { %v2425_v40 = vpop.xlane.xlu1 %2424 }
 0x5b6   : > { %v2433_v41 = vsub.f32 %v2261_v18, %v2425_v40 }
 0x5b8   : > { %v2438_v42 = vmul.f32 1.442695, %v2433_v41 }
 0x5b9   : > { %v2543_v44 = vpop.permute.xlu1 %2542  ;;  %v2431_v45 = vpop.xlane.xlu0 %2430 }
 0x5ba   : > { %5216 = vpow2.f32 %v2438_v42  ;;  %4881 = vmatpush3.msra.mxu1 %v2543_v44  ;;  %v2435_v54 = vsub.f32 %v2417_v23, %v2431_v45 }
 0x5bb   : > { %4890 = vmatprep.subr.mxu1 %v5573_v20 }
 0x5bc   : > { %v2442_v56 = vmul.f32 1.442695, %v2435_v54 }
 0x5bd   : > { %v2466_v49 = vpop.permute.xlu0 %2465  ;;  %v2620_v6 = vpop.permute.xlu1 %2619 }
 0x5be   : > { %4876 = vmatpush3.msra.mxu0 %v2466_v49  ;;  %5218 = vpow2.f32 %v2442_v56 }
 0x5bf   : > { %4885 = vmatprep.subr.mxu0 %v5573_v20 }
 0x5c1   : > { %v2775_v61 = vpop.permute.xlu0 %2774  ;;  %v2697_v12 = vpop.permute.xlu1 %2696 }
 0x5c4   : > { %v5217_v50 = vpop.eup %5216 }
 0x5c5   : > { %v2447_v52 = vsel %vm1467_vm4, %v5217_v50, 0.0  ;;  %v2853_v13 = vpop.permute.xlu1 %2852 }
 0x5c6   : > { %2448 = vadd.xlane.f32.xlu1 %v2447_v52 }
 0x5c8   : > { %v5219_v59 = vpop.eup %5218 }
 0x5c9   : > { %v2453_v60 = vsel %vm1467_vm4, %v5219_v59, 0.0 }
 0x5d7   : > { %2850 = vrot.lane.b32.xlu1 %v6132_v31, %s5576_s8 }
 0x5fb   : > { %2454 = vadd.xlane.f32.xlu1 %v2453_v60 }
 0x60c   : > { %3008 = vrot.lane.b32.xlu1 %v6161_v48, %s5576_s8 }
 0x610   : > { %3006 = vrot.lane.b32.xlu1 %v6136_v37, %s5576_s8 }
 0x614   : > { %3204 = vrot.lane.b32.xlu1 %v6182_v51, %s5576_s8 }
 0x618   : > { %3280 = vrot.lane.b32.xlu1 %v6190_v57, %s5576_s8 }
 0x619   : > { %v2446_v62 = vpop.xlane.xlu0 %2445 }
 0x61a   : > { %5220 = vrcp.f32 %v2446_v62 }
 0x61c   : > { %3356 = vrot.lane.b32.xlu1 %v6188_v55, %s5576_s8 }
 0x61d   : > { %v2452_v63 = vpop.xlane.xlu0 %2451 }
 0x61e   : > { %5222 = vrcp.f32 %v2452_v63 }
 0x621   : > { %v2773_v2 = vpop.permute.xlu0 %2772 }
 0x624   : > { %v5221_v0 = vpop.eup %5220 }
 0x625   : > { %v2460_v5 = vmul.f32 %v5221_v0, %v5213_v34  ;;  %v2931_v9 = vpop.permute.xlu0 %2930 }
 0x627   : > { %4878 = vmatmul.mubr.msk.f32.vlgmr.msra.gmra.mrb[18].mxu0 %vm1467_vm4, %v2460_v5 }
 0x628   : > { %v5223_v7 = vpop.eup %5222  ;;  %4886 = vmatpush3.msra.mxu0 %v2620_v6  ;;  %4887 = vmatprep.mubr.msk.f32.mxu0 %vm5574_vm3, %v5573_v20 }
 0x629   : > { %v2462_v8 = vmul.f32 %v5223_v7, %v5215_v36  ;;  %4895 = vmatprep.subr.mxu0 %v5573_v20  ;;  %v2929_v10 = vpop.permute.xlu0 %2928 }
 0x62b   : > { %4888 = vmatmul.mubr.msk.f32.vlgmr.msra.gmra.mrb[20].mxu0 %vm1467_vm4, %v2462_v8 }
 0x62c   : > { %4897 = vmatprep.mubr.msk.f32.mxu0 %vm5574_vm3, %v5573_v20 }
 0x62d   : > { %v3129_v11 = vpop.permute.xlu0 %3128 }
 0x62f   : > { %4896 = vmatpush3.xpose.msk.msra.mxu0 %vm1467_vm4, %v2775_v61 }
 0x630   : > { %4905 = vmatprep.subr.mxu0 %v5573_v20 }
 0x632   : > { %4898 = vmatmul.mubr.msk.f32.vlgmr.msra.gmra.mrb[22].mxu0 %vm1467_vm4, %v2773_v2 }
 0x633   : > { %4906 = vmatpush3.xpose.msk.msra.mxu0 %vm1467_vm4, %v2931_v9  ;;  %4907 = vmatprep.mubr.msk.f32.mxu0 %vm5574_vm3, %v5573_v20 }
 0x634   : > { %4915 = vmatprep.subr.mxu0 %v5573_v20 }
 0x636   : > { %4908 = vmatmul.mubr.msk.f32.vlgmr.msra.gmra.mrb[24].mxu0 %vm1467_vm4, %v2929_v10 }
 0x637   : > { %4916 = vmatpush3.msra.mxu0 %v3129_v11  ;;  %4917 = vmatprep.mubr.msk.f32.mxu0 %vm5574_vm3, %v5573_v20 }
 0x638   : > { %4925 = vmatprep.subr.mxu0 %v5573_v20 }
 0x653   : > { %v2449_v14 = vpop.xlane.xlu1 %2448 }
 0x654   : > { %5224 = vrcp.f32 %v2449_v14 }
 0x657   : > { %v2851_v18 = vpop.permute.xlu1 %2850 }
 0x65e   : > { %v5225_v16 = vpop.eup %5224 }
 0x65f   : > { %v2461_v17 = vmul.f32 %v5225_v16, %v5217_v50 }
 0x661   : > { %4883 = vmatmul.mubr.msk.f32.vlgmr.msra.gmra.mrb[22].mxu1 %vm1467_vm4, %v2461_v17 }
 0x662   : > { %4891 = vmatpush3.msra.mxu1 %v2697_v12  ;;  %4892 = vmatprep.mubr.msk.f32.mxu1 %vm5574_vm3, %v5573_v20 }
 0x663   : > { %4900 = vmatprep.subr.mxu1 %v5573_v20 }
 0x688   : > { %v2455_v19 = vpop.xlane.xlu1 %2454 }
 0x689   : > { %5226 = vrcp.f32 %v2455_v19 }
 0x68c   : > { %v3009_v21 = vpop.permute.xlu1 %3008 }
 0x690   : > { %v3007_v24 = vpop.permute.xlu1 %3006 }
 0x693   : > { %v5227_v22 = vpop.eup %5226 }
 0x694   : > { %v2463_v23 = vmul.f32 %v5227_v22, %v5219_v59  ;;  %v3205_v25 = vpop.permute.xlu1 %3204 }
 0x696   : > { %4893 = vmatmul.mubr.msk.f32.vlgmr.msra.gmra.mrb[24].mxu1 %vm1467_vm4, %v2463_v23 }
 0x697   : > { %4901 = vmatpush3.xpose.msk.msra.mxu1 %vm1467_vm4, %v2853_v13  ;;  %4902 = vmatprep.mubr.msk.f32.mxu1 %vm5574_vm3, %v5573_v20 }
 0x698   : > { %4910 = vmatprep.subr.mxu1 %v5573_v20 }
 0x69a   : > { %4903 = vmatmul.mubr.msk.f32.vlgmr.msra.gmra.mrb[26].mxu1 %vm1467_vm4, %v2851_v18 }
 0x69b   : > { %4911 = vmatpush3.xpose.msk.msra.mxu1 %vm1467_vm4, %v3009_v21  ;;  %4912 = vmatprep.mubr.msk.f32.mxu1 %vm5574_vm3, %v5573_v20 }
 0x69c   : > { %4920 = vmatprep.subr.mxu1 %v5573_v20 }
 0x69e   : > { %4913 = vmatmul.mubr.msk.f32.vlgmr.msra.gmra.mrb[28].mxu1 %vm1467_vm4, %v3007_v24 }
 0x69f   : > { %4921 = vmatpush3.msra.mxu1 %v3205_v25  ;;  %4922 = vmatprep.mubr.msk.f32.mxu1 %vm5574_vm3, %v5573_v20 }
 0x6a0   : > { %4930 = vmatprep.subr.mxu1 %v5573_v20 }
 0x6fa   : > { %v6351_v26 = vpop.f32.mrb[18].mxu0 }
 0x6fb   : > { %v4879_v27 = vpop.f32.mrb[19].mxu0 }
 0x6fe   : > { %v6353_v28 = vpop.f32.mrb[20].mxu0 }
 0x6ff   : > { %v4889_v29 = vpop.f32.mrb[21].mxu0 }
 0x705   : > { %v2846_v30 = vpop.f32.mrb[22].mxu0 }
 0x706   : > { %v2847_v32 = vadd.f32 %v2846_v30, %v6195_v58  ;;  %v4899_v34 = vpop.f32.mrb[23].mxu0 }
 0x708   : > { %v3084_v35 = vsel %vm1467_vm4, %v2847_v32, -inf }
 0x709   : > { %3085 = vmax.xlane.f32.xlu0 %v3084_v35  ;;  %v3002_v36 = vpop.f32.mrb[24].mxu0 }
 0x70a   : > { %v3003_v38 = vadd.f32 %v3002_v36, %v6195_v58  ;;  %v4909_v40 = vpop.f32.mrb[25].mxu0 }
 0x70c   : > { %v3090_v41 = vsel %vm1467_vm4, %v3003_v38, -inf }
 0x70d   : > { %3091 = vmax.xlane.f32.xlu0 %v3090_v41 }
 0x734   : > { %v6359_v42 = vpop.f32.mrb[22].mxu1 }
 0x735   : > { %v4884_v44 = vpop.f32.mrb[23].mxu1 }
 0x769   : > { %v6361_v45 = vpop.f32.mrb[24].mxu1 }
 0x76a   : > { %v4894_v49 = vpop.f32.mrb[25].mxu1 }
 0x76d   : > { %v2924_v50 = vpop.f32.mrb[26].mxu1 }
 0x76e   : > { %v2925_v52 = vadd.f32 %v2924_v50, %v6195_v58  ;;  %v4904_v54 = vpop.f32.mrb[27].mxu1 }
 0x770   : > { %v3087_v56 = vsel %vm1467_vm4, %v2925_v52, -inf }
 0x771   : > { %3088 = vmax.xlane.f32.xlu1 %v3087_v56  ;;  %v3080_v59 = vpop.f32.mrb[28].mxu1 }
 0x772   : > { %v3081_v60 = vadd.f32 %v3080_v59, %v6195_v58  ;;  %v4914_v61 = vpop.f32.mrb[29].mxu1 }
 0x774   : > { %v3093_v62 = vsel %vm1467_vm4, %v3081_v60, -inf }
 0x775   : > { %3094 = vmax.xlane.f32.xlu0 %v3093_v62 }
 0x782   : > { %3512 = vrot.lane.b32.xlu1 %v6148_v46, %s5577_s2 }
 0x786   : > { %3510 = vrot.lane.b32.xlu1 %v6132_v31, %s5577_s2 }
 0x78b   : > { %3434 = vrot.lane.b32.xlu0 %v6143_v43, %s5577_s2  ;;  %v3281_v43 = vpop.permute.xlu1 %3280 }
 0x78f   : > { %v3357_v10 = vpop.permute.xlu1 %3356 }
 0x796   : > { %v3086_v63 = vpop.xlane.xlu0 %3085 }
 0x797   : > { %v3096_v0 = vsub.f32 %v2847_v32, %v3086_v63 }
 0x799   : > { %v3100_v2 = vmul.f32 1.442695, %v3096_v0 }
 0x79a   : > { %v3092_v7 = vpop.xlane.xlu0 %3091 }
 0x79b   : > { %5228 = vpow2.f32 %v3100_v2  ;;  %v3098_v8 = vsub.f32 %v3003_v38, %v3092_v7 }
 0x79d   : > { %v3104_v46 = vmul.f32 1.442695, %v3098_v8 }
 0x79f   : > { %5230 = vpow2.f32 %v3104_v46 }
 0x7a5   : > { %v5229_v5 = vpop.eup %5228 }
 0x7a6   : > { %v3108_v6 = vsel %vm1467_vm4, %v5229_v5, 0.0 }
 0x7a9   : > { %v5231_v9 = vpop.eup %5230 }
 0x7aa   : > { %3109 = vadd.xlane.f32.xlu0 %v3108_v6  ;;  %v3114_v31 = vsel %vm1467_vm4, %v5231_v9, 0.0 }
 0x7c0   : > { %3432 = vrot.lane.b32.xlu0 %v6134_v33, %s5577_s2 }
 0x7df   : > { %3115 = vadd.xlane.f32.xlu0 %v3114_v31 }
 0x7f5   : > { %3590 = vrot.lane.b32.xlu0 %v6150_v47, %s5577_s2 }
 0x7f9   : > { %3588 = vrot.lane.b32.xlu0 %v6138_v39, %s5577_s2 }
 0x7fe   : > { %v3089_v11 = vpop.xlane.xlu1 %3088 }
 0x7ff   : > { %v3097_v12 = vsub.f32 %v2925_v52, %v3089_v11 }
 0x801   : > { %v3102_v13 = vmul.f32 1.442695, %v3097_v12 }
 0x802   : > { %v3095_v16 = vpop.xlane.xlu0 %3094  ;;  %v3513_v30 = vpop.permute.xlu1 %3512 }
 0x803   : > { %5232 = vpow2.f32 %v3102_v13  ;;  %v3099_v17 = vsub.f32 %v3081_v60, %v3095_v16 }
 0x805   : > { %v3106_v18 = vmul.f32 1.442695, %v3099_v17 }
 0x806   : > { %v3435_v19 = vpop.permute.xlu0 %3434  ;;  %v3511_v32 = vpop.permute.xlu1 %3510 }
 0x807   : > { %5234 = vpow2.f32 %v3106_v18 }
 0x80d   : > { %v5233_v33 = vpop.eup %5232 }
 0x80e   : > { %v3111_v14 = vsel %vm1467_vm4, %v5233_v33, 0.0 }
 0x80f   : > { %3112 = vadd.xlane.f32.xlu1 %v3111_v14 }
 0x811   : > { %v5235_v39 = vpop.eup %5234 }
 0x812   : > { %v3117_v23 = vsel %vm1467_vm4, %v5235_v39, 0.0 }
 0x820   : > { %3668 = vrot.lane.b32.xlu1 %v6161_v48, %s5577_s2 }
 0x837   : > { %v3110_v47 = vpop.xlane.xlu0 %3109 }
 0x838   : > { %5236 = vrcp.f32 %v3110_v47 }
 0x83b   : > { %v3433_v48 = vpop.permute.xlu0 %3432 }
 0x842   : > { %v5237_v21 = vpop.eup %5236 }
 0x843   : > { %v3124_v22 = vmul.f32 %v5237_v21, %v5229_v5 }
 0x844   : > { %3118 = vadd.xlane.f32.xlu1 %v3117_v23 }
 0x845   : > { %4918 = vmatmul.mubr.msk.f32.vlgmr.msra.gmra.mrb[26].mxu0 %vm1467_vm4, %v3124_v22 }
 0x846   : > { %4926 = vmatpush3.msra.mxu0 %v3281_v43  ;;  %4927 = vmatprep.mubr.msk.f32.mxu0 %vm5574_vm3, %v5573_v20 }
 0x847   : > { %4935 = vmatprep.subr.mxu0 %v5573_v20 }
 0x855   : > { %3666 = vrot.lane.b32.xlu1 %v6136_v37, %s5577_s2 }
 0x86c   : > { %v3116_v24 = vpop.xlane.xlu0 %3115 }
 0x86d   : > { %5238 = vrcp.f32 %v3116_v24 }
 0x870   : > { %v3591_v29 = vpop.permute.xlu0 %3590 }
 0x874   : > { %v3589_v37 = vpop.permute.xlu0 %3588 }
 0x877   : > { %v5239_v25 = vpop.eup %5238 }
 0x878   : > { %v3126_v27 = vmul.f32 %v5239_v25, %v5231_v9 }
 0x87a   : > { %4928 = vmatmul.mubr.msk.f32.vlgmr.msra.gmra.mrb[28].mxu0 %vm1467_vm4, %v3126_v27 }
 0x87b   : > { %4936 = vmatpush3.xpose.msk.msra.mxu0 %vm1467_vm4, %v3435_v19  ;;  %4937 = vmatprep.mubr.msk.f32.mxu0 %vm5574_vm3, %v5573_v20 }
 0x87c   : > { %4945 = vmatprep.subr.mxu0 %v5573_v20 }
 0x87e   : > { %4938 = vmatmul.mubr.msk.f32.vlgmr.msra.gmra.mrb[30].mxu0 %vm1467_vm4, %v3433_v48 }
 0x87f   : > { %4946 = vmatpush3.xpose.msk.msra.mxu0 %vm1467_vm4, %v3591_v29  ;;  %4947 = vmatprep.mubr.msk.f32.mxu0 %vm5574_vm3, %v5573_v20 }
 0x880   : > { %4955 = vmatprep.subr.mxu0 %v5573_v20 }
 0x882   : > { %4948 = vmatmul.mubr.msk.f32.vlgmr.msra.gmra.mrb[32].mxu0 %vm1467_vm4, %v3589_v37 }
 0x883   : > { %4957 = vmatprep.mubr.msk.f32.mxu0 %vm5574_vm3, %v5573_v20 }
 0x89c   : > { %v3113_v34 = vpop.xlane.xlu1 %3112 }
 0x89d   : > { %5240 = vrcp.f32 %v3113_v34 }
 0x8a0   : > { %v3669_v38 = vpop.permute.xlu1 %3668 }
 0x8a7   : > { %v5241_v35 = vpop.eup %5240 }
 0x8a8   : > { %v3125_v36 = vmul.f32 %v5241_v35, %v5233_v33 }
 0x8aa   : > { %4923 = vmatmul.mubr.msk.f32.vlgmr.msra.gmra.mrb[30].mxu1 %vm1467_vm4, %v3125_v36 }
 0x8ab   : > { %4931 = vmatpush3.msra.mxu1 %v3357_v10  ;;  %4932 = vmatprep.mubr.msk.f32.mxu1 %vm5574_vm3, %v5573_v20 }
 0x8ac   : > { %4940 = vmatprep.subr.mxu1 %v5573_v20 }
 0x8d1   : > { %v3119_v40 = vpop.xlane.xlu1 %3118 }
 0x8d2   : > { %5242 = vrcp.f32 %v3119_v40 }
 0x8d5   : > { %v3667_v49 = vpop.permute.xlu1 %3666 }
 0x8dc   : > { %v5243_v41 = vpop.eup %5242 }
 0x8dd   : > { %v3127_v44 = vmul.f32 %v5243_v41, %v5235_v39 }
 0x8df   : > { %4933 = vmatmul.mubr.msk.f32.vlgmr.msra.gmra.mrb[32].mxu1 %vm1467_vm4, %v3127_v44 }
 0x8e0   : > { %4941 = vmatpush3.xpose.msk.msra.mxu1 %vm1467_vm4, %v3513_v30  ;;  %4942 = vmatprep.mubr.msk.f32.mxu1 %vm5574_vm3, %v5573_v20 }
 0x8e1   : > { %4950 = vmatprep.subr.mxu1 %v5573_v20 }
 0x8e3   : > { %4943 = vmatmul.mubr.msk.f32.vlgmr.msra.gmra.mrb[34].mxu1 %vm1467_vm4, %v3511_v32 }
 0x8e4   : > { %4951 = vmatpush3.xpose.msk.msra.mxu1 %vm1467_vm4, %v3669_v38  ;;  %4952 = vmatprep.mubr.msk.f32.mxu1 %vm5574_vm3, %v5573_v20 }
 0x8e5   : > { %4960 = vmatprep.subr.mxu1 %v5573_v20 }
 0x8e7   : > { %4953 = vmatmul.mubr.msk.f32.vlgmr.msra.gmra.mrb[36].mxu1 %vm1467_vm4, %v3667_v49 }
 0x8e8   : > { %4962 = vmatprep.mubr.msk.f32.mxu1 %vm5574_vm3, %v5573_v20 }
 0x918   : > { %v3200_v50 = vpop.f32.mrb[26].mxu0 }
 0x919   : > { %v4919_v52 = vpop.f32.mrb[27].mxu0 }
 0x94d   : > { %v3352_v54 = vpop.f32.mrb[28].mxu0 }
 0x94e   : > { %v4929_v56 = vpop.f32.mrb[29].mxu0 }
 0x951   : > { %v3506_v59 = vpop.f32.mrb[30].mxu0 }
 0x952   : > { %v3507_v60 = vadd.f32 %v3506_v59, %v6195_v58  ;;  %v4939_v61 = vpop.f32.mrb[31].mxu0 }
 0x953   : > { %v4154_v61 = vld [vmem:[#allocation14] sm:$0xff] }
 0x954   : > { %v3744_v62 = vsel %vm1467_vm4, %v3507_v60, -inf }
 0x955   : > { %3745 = vmax.xlane.f32.xlu0 %v3744_v62  ;;  %v3662_v63 = vpop.f32.mrb[32].mxu0  ;;  %v4155_v62 = vld [vmem:[#allocation14 + $0x8] sm:$0xff] }
 0x956   : > { %v3663_v0 = vadd.f32 %v3662_v63, %v6195_v58  ;;  %v4949_v2 = vpop.f32.mrb[33].mxu0  ;;  %v5045_v63 = vpack.c.bf16 %v4155_v62, %v4154_v61 }
 0x957   : > { %v4157_v2 = vld [vmem:[#allocation14 + $0x18] sm:$0xff] }
 0x958   : > { %v3750_v5 = vsel %vm1467_vm4, %v3663_v0, -inf }
 0x959   : > { %3751 = vmax.xlane.f32.xlu0 %v3750_v5 }
 0x97d   : > { %v6425_v6 = vpop.f32.mrb[30].mxu1 }
 0x97e   : > { %v4924_v7 = vpop.f32.mrb[31].mxu1 }
 0x9b2   : > { %v6427_v8 = vpop.f32.mrb[32].mxu1 }
 0x9b3   : > { %v4934_v46 = vpop.f32.mrb[33].mxu1 }
 0x9b6   : > { %v3584_v9 = vpop.f32.mrb[34].mxu1 }
 0x9b7   : > { %v3585_v31 = vadd.f32 %v3584_v9, %v6195_v58  ;;  %v4944_v43 = vpop.f32.mrb[35].mxu1 }
 0x9b9   : > { %v3747_v10 = vsel %vm1467_vm4, %v3585_v31, -inf }
 0x9ba   : > { %3748 = vmax.xlane.f32.xlu1 %v3747_v10  ;;  %v3740_v11 = vpop.f32.mrb[36].mxu1 }
 0x9bb   : > { %v3741_v12 = vadd.f32 %v3740_v11, %v6195_v58  ;;  %v4954_v13 = vpop.f32.mrb[37].mxu1 }
 0x9bd   : > { %v3753_v33 = vsel %vm1467_vm4, %v3741_v12, -inf }
 0x9be   : > { %3754 = vmax.xlane.f32.xlu0 %v3753_v33 }
 0x9e2   : > { %v3746_v14 = vpop.xlane.xlu0 %3745 }
 0x9e3   : > { %v3756_v16 = vsub.f32 %v3507_v60, %v3746_v14 }
 0x9e5   : > { %v3760_v17 = vmul.f32 1.442695, %v3756_v16 }
 0x9e6   : > { %v3752_v18 = vpop.xlane.xlu0 %3751 }
 0x9e7   : > { %5244 = vpow2.f32 %v3760_v17  ;;  %v3758_v19 = vsub.f32 %v3663_v0, %v3752_v18  ;;  %v4156_v0 = vld [vmem:[#allocation14 + $0x10] sm:$0xff] }
 0x9e9   : > { %v3764_v47 = vmul.f32 1.442695, %v3758_v19 }
 0x9eb   : > { %5246 = vpow2.f32 %v3764_v47 }
 0x9f1   : > { %v5245_v39 = vpop.eup %5244 }
 0x9f2   : > { %v3768_v21 = vsel %vm1467_vm4, %v5245_v39, 0.0 }
 0x9f3   : > { %3769 = vadd.xlane.f32.xlu0 %v3768_v21 }
 0x9f5   : > { %v5247_v22 = vpop.eup %5246 }
 0x9f6   : > { %v3774_v23 = vsel %vm1467_vm4, %v5247_v22, 0.0 }
 0x9f7   : > { %3775 = vadd.xlane.f32.xlu0 %v3774_v23 }
 0xa0d   : > { %3788 = vrot.lane.b32.xlu0 %v6186_v53, %s5577_s2 }
 0xa11   : > { %4096 = vrot.lane.b32.xlu0 %v6351_v26, %s5578_s27 }
 0xa15   : > { %4112 = vrot.lane.b32.xlu0 %v3200_v50, %s5579_s16 }
 0xa19   : > { %4100 = vrot.lane.b32.xlu0 %v6353_v28, %s5578_s27 }
 0xa1d   : > { %4116 = vrot.lane.b32.xlu0 %v3352_v54, %s5579_s16 }
 0xa47   : > { %v3749_v58 = vpop.xlane.xlu1 %3748 }
 0xa48   : > { %v3757_v48 = vsub.f32 %v3585_v31, %v3749_v58 }
 0xa4a   : > { %v3762_v24 = vmul.f32 1.442695, %v3757_v48  ;;  %v4575_v48 = vld [vmem:[%s6644_s12] ss:$0 sm:$0xff] }
 0xa4b   : > { %v3755_v53 = vpop.xlane.xlu0 %3754 }
 0xa4c   : > { %5248 = vpow2.f32 %v3762_v24  ;;  %v3759_v26 = vsub.f32 %v3741_v12, %v3755_v53 }
 0xa4e   : > { %v3766_v29 = vmul.f32 1.442695, %v3759_v26 }
 0xa56   : > { %v5249_v25 = vpop.eup %5248 }
 0xa57   : > { %v3771_v27 = vsel %vm1467_vm4, %v5249_v25, 0.0 }
 0xa58   : > { %3772 = vadd.xlane.f32.xlu1 %v3771_v27 }
 0xa69   : > { %3864 = vrot.lane.b32.xlu1 %v6182_v51, %s5577_s2 }
 0xa6d   : > { %3940 = vrot.lane.b32.xlu1 %v6190_v57, %s5577_s2 }
 0xa80   : > { %v3770_v28 = vpop.xlane.xlu0 %3769 }
 0xa81   : > { %5250 = vrcp.f32 %v3770_v28 }
 0xa82   : > { %5252 = vpow2.f32 %v3766_v29 }
 0xa84   : > { %v3776_v37 = vpop.xlane.xlu0 %3775 }
 0xa85   : > { %5254 = vrcp.f32 %v3776_v37 }
 0xa88   : > { %v3789_v30 = vpop.permute.xlu0 %3788 }
 0xa89   : > { %4956 = vmatpush3.msra.mxu0 %v3789_v30 }
 0xa8a   : > { %4965 = vmatprep.subr.mxu0 %v5573_v20 }
 0xa8b   : > { %v5251_v32 = vpop.eup %5250 }
 0xa8c   : > { %v3784_v34 = vmul.f32 %v5251_v32, %v5245_v39  ;;  %v4097_v35 = vpop.permute.xlu0 %4096  ;;  %v5253_v36 = vpop.eup %5252 }
 0xa8d   : > { %v3777_v57 = vsel %vm1467_vm4, %v5253_v36, 0.0  ;;  %v4140_v9 = vsel %vm1467_vm4, %v6261_v1, %v4097_v35 }
 0xa8e   : > { %4958 = vmatmul.mubr.msk.f32.vlgmr.msra.gmra.mrb[34].mxu0 %vm1467_vm4, %v3784_v34 }
 0xa8f   : > { %4967 = vmatprep.mubr.msk.f32.mxu0 %vm5574_vm3, %v5573_v20  ;;  %v5255_v44 = vpop.eup %5254 }
 0xa90   : > { %v4113_v51 = vpop.permute.xlu0 %4112 }
 0xa91   : > { %3778 = vadd.xlane.f32.xlu1 %v3777_v57  ;;  %v4145_v31 = vsel %vm4144_vm5, %v4140_v9, %v4113_v51 }
 0xa94   : > { %v4101_v38 = vpop.permute.xlu0 %4100 }
 0xa95   : > { %v6455_v40 = vsel %vm1467_vm4, %v6265_v4, %v4101_v38 }
 0xa98   : > { %v4117_v46 = vpop.permute.xlu0 %4116 }
 0xa99   : > { %v4147_v47 = vsel %vm4144_vm5, %v6455_v40, %v4117_v46 }
 0xaa2   : > { %4016 = vrot.lane.b32.xlu1 %v6188_v55, %s5577_s2  ;;  %v3786_v55 = vmul.f32 %v5255_v44, %v5247_v22 }
 0xaa6   : > { %4098 = vrot.lane.b32.xlu1 %v6359_v42, %s5578_s27 }
 0xaaa   : > { %4114 = vrot.lane.b32.xlu1 %v6425_v6, %s5579_s16 }
 0xaae   : > { %4102 = vrot.lane.b32.xlu1 %v6361_v45, %s5578_s27 }
 0xab2   : > { %4118 = vrot.lane.b32.xlu1 %v6427_v8, %s5579_s16 }
 0xae5   : > { %v3773_v41 = vpop.xlane.xlu1 %3772 }
 0xae6   : > { %5256 = vrcp.f32 %v3773_v41 }
 0xae9   : > { %v3865_v4 = vpop.permute.xlu1 %3864 }
 0xaea   : > { %4961 = vmatpush3.msra.mxu1 %v3865_v4 }
 0xaeb   : > { %4970 = vmatprep.subr.mxu1 %v5573_v20 }
 0xaed   : > { %v3941_v49 = vpop.permute.xlu1 %3940 }
 0xaee   : > { %4966 = vmatpush3.msra.mxu0 %v3941_v49 }
 0xaef   : > { %4968 = vmatmul.mubr.msk.f32.vlgmr.msra.gmra.mrb[36].mxu0 %vm1467_vm4, %v3786_v55  ;;  %5046 = vmatprep.subr.bf16.mxu0 %v5045_v63 }
 0xaf0   : > { %v5257_v42 = vpop.eup %5256  ;;  %5048 = vmatpush3.bf16.msra.mxu0 %v5045_v63 }
 0xaf1   : > { %v3785_v50 = vmul.f32 %v5257_v42, %v5249_v25 }
 0xaf3   : > { %4963 = vmatmul.mubr.msk.f32.vlgmr.msra.gmra.mrb[38].mxu1 %vm1467_vm4, %v3785_v50 }
 0xaf4   : > { %4972 = vmatprep.mubr.msk.f32.mxu1 %vm5574_vm3, %v5573_v20  ;;  %v5049_v20 = vpack.c.bf16 %v4157_v2, %v4156_v0 }
 0xaf6   : > { %5050 = vmatprep.subr.bf16.mxu0 %v5049_v20 }
 0xaf7   : > { %5052 = vmatpush3.bf16.msra.mxu0 %v5049_v20 }
 0xb1e   : > { %v3779_v45 = vpop.xlane.xlu1 %3778 }
 0xb1f   : > { %5258 = vrcp.f32 %v3779_v45 }
 0xb22   : > { %v4017_v52 = vpop.permute.xlu1 %4016 }
 0xb23   : > { %4971 = vmatpush3.msra.mxu1 %v4017_v52 }
 0xb26   : > { %v4099_v13 = vpop.permute.xlu1 %4098 }
 0xb27   : > { %v4141_v17 = vsel %vm1467_vm4, %v6263_v3, %v4099_v13 }
 0xb29   : > { %v5259_v54 = vpop.eup %5258 }
 0xb2a   : > { %v3787_v56 = vmul.f32 %v5259_v54, %v5253_v36  ;;  %v4115_v33 = vpop.permute.xlu1 %4114 }
 0xb2b   : > { %v4146_v1 = vsel %vm4144_vm5, %v4141_v17, %v4115_v33 }
 0xb2c   : > { %4973 = vmatmul.mubr.msk.f32.vlgmr.msra.gmra.mrb[40].mxu1 %vm1467_vm4, %v3787_v56 }
 0xb2e   : > { %v4103_v14 = vpop.permute.xlu1 %4102 }
 0xb2f   : > { %v4143_v3 = vsel %vm1467_vm4, %v6271_v15, %v4103_v14 }
 0xb32   : > { %v4119_v16 = vpop.permute.xlu1 %4118 }
 0xb33   : > { %v4148_v22 = vsel %vm4144_vm5, %v4143_v3, %v4119_v16 }
 0xb61   : > { %v3860_v59 = vpop.f32.mrb[34].mxu0 }
 0xb62   : > { %4128 = vrot.lane.b32.xlu0 %v3860_v59, %s5580_s14  ;;  %v4959_v60 = vpop.f32.mrb[35].mxu0 }
 0xbc2   : > { %v4012_v5 = vpop.f32.mrb[36].mxu0 }
 0xbc3   : > { %4132 = vrot.lane.b32.xlu0 %v4012_v5, %s5580_s14  ;;  %v4969_v6 = vpop.f32.mrb[37].mxu0 }
 0xbc6   : > { %v3936_v7 = vpop.f32.mrb[38].mxu1 }
 0xbc7   : > { %v4964_v8 = vpop.f32.mrb[39].mxu1  ;;  %4130 = vrot.lane.b32.xlu1 %v3936_v7, %s5580_s14 }
 0xbd4   : > { %v4129_v43 = vpop.permute.xlu0 %4128 }
 0xbd5   : > { %v4150_v10 = vsel %vm4149_vm6, %v4145_v31, %v4129_v43 }
 0xbd6   : > { %4983 = vmatprep.mubr.msk.f32.mxu0 %vm687_vm2, %v4150_v10 }
 0xbff   : > { %v4088_v11 = vpop.f32.mrb[40].mxu1 }
 0xc00   : > { %4134 = vrot.lane.b32.xlu1 %v4088_v11, %s5580_s14  ;;  %v4974_v12 = vpop.f32.mrb[41].mxu1 }
 0xc35   : > { %v4133_v18 = vpop.permute.xlu0 %4132 }
 0xc36   : > { %v4152_v21 = vsel %vm4149_vm6, %v4147_v47, %v4133_v18 }
 0xc39   : > { %v4131_v19 = vpop.permute.xlu1 %4130 }
 0xc3a   : > { %v4151_v39 = vsel %vm4149_vm6, %v4146_v1, %v4131_v19 }
 0xc3b   : > { %4984 = vmatmul.mubr.msk.f32.vlgmr.msra.gmra.mrb[38].mxu0 %vm687_vm2, %v4151_v39 }
 0xc3c   : > { %4986 = vmatprep.mubr.msk.f32.mxu0 %vm687_vm2, %v4152_v21 }
 0xc72   : > { %v4135_v23 = vpop.permute.xlu1 %4134 }
 0xc73   : > { %v4153_v58 = vsel %vm4149_vm6, %v4148_v22, %v4135_v23 }
 0xc74   : > { %4987 = vmatmul.mubr.msk.f32.gmra.mrb[40].mxu0 %vm687_vm2, %v4153_v58 }
 0xd0e   : > { %v4985_v24 = vpop.f32.mrb[38].mxu0 }
 0xd0f   : > { %v4249_v25 = vadd.f32 %v4985_v24, %v4575_v48  ;;  %v4243_v27 = vpop.f32.mrb[39].mxu0 }
 0xd10   : > { %v4244_v53 = vadd.f32 %v4575_v48, %v4243_v27 }
 0xd11   : > { %4263 = vst.msk [vmem:[%s642_s13 + $0x8] sm:$0xff] %vm687_vm2, %v4249_v25 }
 0xd12   : > { %4262 = vst.msk [vmem:[%s642_s13] sm:$0xff] %vm687_vm2, %v4244_v53 }
 0xd47   : > { %v4988_v15 = vpop.f32.mrb[40].mxu0 }
 0xd48   : > { %v4259_v26 = vadd.f32 %v4988_v15, %v4575_v48  ;;  %v4253_v29 = vpop.f32.mrb[41].mxu0 }
 0xd49   : > { %v4254_v28 = vadd.f32 %v4575_v48, %v4253_v29 }
 0xd4a   : > { %4265 = vst.msk [vmem:[%s642_s13 + $0x18] sm:$0xff] %vm687_vm2, %v4259_v26 }
 0xd4b   : > { %4264 = vst.msk [vmem:[%s642_s13 + $0x10] sm:$0xff] %vm687_vm2, %v4254_v28 }
 0xd4c   : > { %5477 = shalt.err (!%p5474_p12)
}
 0xd4d   : > { %s5478_s8 = scalar_lea.hbm %s6504_s5, 512  ;;  %s5482_s14 = scalar_lea.hbm %s6646_s15, 1024 }
 0xd4e   : > { %p5479_p11 = scmp.ne.s32.totalorder %s6504_s5, %s5478_s8  ;;  %p5483_p0 = scmp.lt.u32.totalorder %s6504_s5, %s6646_s15 }
 0xd4f   : > { %p5484_p1 = scmp.lt.u32.totalorder %s5482_s14, %s5478_s8  ;;  %p5486_p4 = scmp.lt.u32.totalorder %s5478_s8, %s6504_s5 }
 0xd50   : > { %p5480_p6 = pnand %p5479_p11, %p6647_p8 }
 0xd51   : > { %p5485_p2 = por %p5484_p1, %p5483_p0 }
 0xd52   : > { %p5481_p7 = pneg %p5480_p6 }
 0xd53   : > { %p5487_p10 = por %p5486_p4, %p5485_p2 }
 0xd55   : > { %p5488_p5 = pnand %p5487_p10, %p5481_p7 }
 0xd57   : > { %5491 = shalt.err (!%p5488_p5)
}
 0xd58   : > { %s5582_s26 = smov 128  }
 0xd59   : > { %5097 = dma.vmem_to_hbm [thread:$0]  (%p6647_p8), %s6499_s23, 512, %s6504_s5, %s4267_s20, %s5582_s26, %s5582_s26, %s5578_s27  }
 0xd5a PF: > { %s6648_s12 = sld [smem:[#allocation22_spill]]  ;;  %s6649_s13 = sld [smem:[#allocation27_spill]] }
 0xd5b   : > { %p6651_p13 = scmp.ge.s32.totalorder %s5562_s0, 2 }
 0xd60   : > { %s4297_s17 = sand.u32 1, %s6648_s12   ;;  %p6650_p9 = scmp.ne.s32.totalorder %s6649_s13, 0 }
 0xd61   : > { %s4298_s7 = scalar_lea.sflag [#allocation5], %s4297_s17 }
 0xd62   : > { %p5123_p3 = pnand %p6651_p13, %p6650_p9 }
 0xd64   : > { %5537 = dma.done.wait (!%p5123_p3), %s4298_s7, 512  }
 0xd65   : > { %5539 = vsyncadd (!%p5123_p3), %s4298_s7, 4294966784  ;;  %s37_s0 = sadd.s32 1, %s5562_s0   ;;  %s6652_s30 = sld [smem:[#allocation23_spill]] }
 0xd66   : > { %p34_p12 = scmp.ge.s32.totalorder %s37_s0, 4   ;;  %s6653_s26 = sld [smem:[#allocation29_spill]] }
 0xd67   : > { %s6654_s21 = sld [smem:[#allocation28_spill]]  ;;  %s6655_s24 = smov %s5546_s25 }
 0xd68   : > { %s6657_s27 = smov %s5558_s28  ;;  %36 = sbr.rel (!%p34_p12) target bundleno = 21 (0x15), region = 170 }
 0xd6b   : > { %s6656_s25 = smov %s6652_s30 }
 0xd6d   : > { %s6658_s28 = smov %s6654_s21 }
 0xd6f   :  { %4303 = vsyncpa [#allocation4], 1 }
 0xd70   :  { %4305 = vsyncpa [#allocation4 + $0x1], 1 }
 0xd71   :  { %4306 = vsyncpa [#allocation7], 1 }
 0xd72   :  { %4308 = vsyncpa [#allocation7 + $0x1], 1 }
 0xd73   :  { %4309 = vsyncpa [#allocation10], 1 }
 0xd74   :  { %4311 = vsyncpa [#allocation10 + $0x1], 1 }
 0xd75   :  { %4312 = vsyncpa [#allocation13], 1 }
 0xd76   :  { %4313 = vsyncpa [#allocation5], 1 }
 0xd77   :  { %4315 = vsyncpa [#allocation5 + $0x1], 1 }

</bundles_post_ra>
